<compile_context>
chip_gen: v6e
topology: v6e:2x2x1
jax: 0.10.0
libtpu: 0.0.40
codegen_flags: <defaults>
</compile_context>

<pallas_src>
import functools
import math

import jax
import jax.numpy as jnp
from jax.experimental import pallas as pl
from jax.experimental.pallas import tpu as pltpu

_NEG_INF = -1e30            # finite "minus infinity" keeps exp() math NaN-free
_COMPUTE_DTYPE = jnp.bfloat16


def _round_up(x, m):
    return ((x + m - 1) // m) * m


def _pick_tile(size, preferred):
    """Largest preferred tile that evenly divides `size`, else the full extent."""
    for t in preferred:
        if t <= size and size % t == 0:
            return t
    return size


def _online_softmax_update(s, v, compute_dtype, m_sc, l_sc, acc_sc):
    """Streaming softmax update; s is (tq, tk) f32, v is (tk, Dv) bf16."""
    m_prev = m_sc[...]                                            # (tq, 1)
    m_new = jnp.maximum(m_prev, jnp.max(s, axis=-1, keepdims=True))
    alpha = jnp.exp(m_prev - m_new)                               # rescale old stats
    p = jnp.exp(s - m_new)                                        # (tq, tk) f32
    l_sc[...] = alpha * l_sc[...] + jnp.sum(p, axis=-1, keepdims=True)
    acc_sc[...] = alpha * acc_sc[...] + jnp.dot(
        p.astype(compute_dtype), v, preferred_element_type=jnp.float32)
    m_sc[...] = m_new


def _flash_attn_masked_kernel(occ_ref, eff_ref, q_ref, k_ref, v_ref, mask_ref,
                              o_ref, m_sc, l_sc, acc_sc, *, compute_dtype):
    # Blocks: q (1,tq,D) bf16 (pre-scaled), k (1,tk,D) bf16, v (1,tk,Dv) bf16,
    #         mask (1,tq,tk) int8 (nonzero => masked), o (1,tq,Dv).
    # occ_ref: flat int32 SMEM occupancy table; eff_ref is only read by index_maps.
    del eff_ref
    b = pl.program_id(0)
    i = pl.program_id(1)
    kv = pl.program_id(2)
    nq = pl.num_programs(1)
    nk = pl.num_programs(2)

    @pl.when(kv == 0)
    def _():
        m_sc[...] = jnp.full_like(m_sc, _NEG_INF)
        l_sc[...] = jnp.zeros_like(l_sc)
        acc_sc[...] = jnp.zeros_like(acc_sc)

    occupied = occ_ref[(b * nq + i) * nk + kv] != 0

    @pl.when(occupied)  # fully-masked kv tiles: skip matmuls + exp entirely
    def _():
        q = q_ref[0]                              # (tq, D)  bf16, already * 1/sqrt(D)
        k = k_ref[0]                              # (tk, D)  bf16
        v = v_ref[0]                              # (tk, Dv) bf16
        mask = mask_ref[0]                        # (tq, tk) int8

        # scores = q @ k^T -- contract the last dims directly (no transpose).
        s = jax.lax.dot_general(
            q, k, dimension_numbers=(((1,), (1,)), ((), ())),
            preferred_element_type=jnp.float32)   # (tq, tk) f32
        s = jnp.where(mask != 0, _NEG_INF, s)

        _online_softmax_update(s, v, compute_dtype, m_sc, l_sc, acc_sc)

    @pl.when(kv == nk - 1)
    def _():
        l = l_sc[...]
        # Fully-masked rows (l == 0) produce 0 instead of NaN (documented divergence).
        l_safe = jnp.where(l == 0.0, 1.0, l)
        inv_l = pl.reciprocal(l_safe, approx=True)                # EUP slot, ~free
        o_ref[0] = (acc_sc[...] * inv_l).astype(o_ref.dtype)


def _flash_attn_nomask_kernel(q_ref, k_ref, v_ref, o_ref, m_sc, l_sc, acc_sc,
                              *, compute_dtype, kv_len, tk, mask_padded_cols):
    # Mask-free variant: no mask stream from HBM at all.  If the key length was
    # padded up to a 128 multiple, the padded columns are masked in-kernel with a
    # couple of iota/compare vreg ops (static flag).
    kv = pl.program_id(2)

    @pl.when(kv == 0)
    def _():
        m_sc[...] = jnp.full_like(m_sc, _NEG_INF)
        l_sc[...] = jnp.zeros_like(l_sc)
        acc_sc[...] = jnp.zeros_like(acc_sc)

    q = q_ref[0]                                  # (tq, D) bf16, already scaled
    k = k_ref[0]                                  # (tk, D) bf16
    v = v_ref[0]                                  # (tk, Dv) bf16

    s = jax.lax.dot_general(
        q, k, dimension_numbers=(((1,), (1,)), ((), ())),
        preferred_element_type=jnp.float32)       # (tq, tk) f32

    if mask_padded_cols:                          # static (trace-time) branch
        col = kv * tk + jax.lax.broadcasted_iota(jnp.int32, s.shape, 1)
        s = jnp.where(col < kv_len, s, _NEG_INF)

    _online_softmax_update(s, v, compute_dtype, m_sc, l_sc, acc_sc)

    @pl.when(kv == pl.num_programs(2) - 1)
    def _():
        inv_l = pl.reciprocal(l_sc[...], approx=True)   # l >= 1 without a mask
        o_ref[0] = (acc_sc[...] * inv_l).astype(o_ref.dtype)


def attention_pallas(q, k, v, attention_mask=None, dropout=0.0, training=False):
    """Scaled dot-product attention matching PyTorch `attention.forward` (eval mode).

    q: (B, Sq, D), k: (B, Sk, D), v: (B, Sk, Dv)
    attention_mask: (B, Sq, Sk) bool/int (nonzero => fill score with -inf), or None.
    """
    B, Sq, D = q.shape
    Bk, Sk, Dk = k.shape
    Bv, Skv, Dv = v.shape
    assert (Bk, Dk) == (B, D) and (Bv, Skv) == (B, Sk)

    if training and dropout > 0.0:
        # TODO(synk): training-mode dropout on the attention probabilities is not
        # implemented (eval-mode nn.Dropout is the identity).
        raise NotImplementedError("training-mode dropout is not implemented")

    out_dtype = q.dtype
    scale = 1.0 / math.sqrt(float(D))

    # Pad sequence lengths up to 128 multiples so flash tiling / lane alignment is
    # never lost; prefer 256/512 tiles (v6e/v7x MXU), fall back to 128 (v5e).
    # tk is capped at 512 so the (tq, tk) f32 score/prob intermediates don't spill.
    Sq_p = _round_up(Sq, 128)
    Sk_p = _round_up(Sk, 128)
    tq = _pick_tile(Sq_p, (256, 128))
    tk = _pick_tile(Sk_p, (512, 256, 128))
    nq = Sq_p // tq
    nk = Sk_p // tk

    # bf16 MXU operands; fold 1/sqrt(D) into the (already required) q cast so the
    # kernel never pays a per-kv-iteration multiply.  Softmax math stays f32.
    qs = (q.astype(jnp.float32) * scale).astype(_COMPUTE_DTYPE)
    ks = k.astype(_COMPUTE_DTYPE)
    vs = v.astype(_COMPUTE_DTYPE)
    if Sq_p != Sq:
        qs = jnp.pad(qs, ((0, 0), (0, Sq_p - Sq), (0, 0)))
    if Sk_p != Sk:
        ks = jnp.pad(ks, ((0, 0), (0, Sk_p - Sk), (0, 0)))
        vs = jnp.pad(vs, ((0, 0), (0, Sk_p - Sk), (0, 0)))

    scratch_shapes = [
        pltpu.VMEM((tq, 1), jnp.float32),     # m (running max)
        pltpu.VMEM((tq, 1), jnp.float32),     # l (running denominator)
        pltpu.VMEM((tq, Dv), jnp.float32),    # acc (running numerator)
    ]
    compiler_params = pltpu.CompilerParams(
        dimension_semantics=("parallel", "parallel", "arbitrary"))

    if attention_mask is None:
        kernel = functools.partial(
            _flash_attn_nomask_kernel, compute_dtype=_COMPUTE_DTYPE,
            kv_len=Sk, tk=tk, mask_padded_cols=(Sk_p != Sk))
        out = pl.pallas_call(
            kernel,
            out_shape=jax.ShapeDtypeStruct((B, Sq_p, Dv), out_dtype),
            grid_spec=pltpu.PrefetchScalarGridSpec(
                num_scalar_prefetch=0,
                grid=(B, nq, nk),
                in_specs=[
                    pl.BlockSpec((1, tq, D), lambda b, i, j: (b, i, 0)),
                    pl.BlockSpec((1, tk, D), lambda b, i, j: (b, j, 0)),
                    pl.BlockSpec((1, tk, Dv), lambda b, i, j: (b, j, 0)),
                ],
                out_specs=pl.BlockSpec((1, tq, Dv), lambda b, i, j: (b, i, 0)),
                scratch_shapes=scratch_shapes),
            compiler_params=compiler_params,
        )(qs, ks, vs)
    else:
        # int8 mask stream (4x less HBM traffic than int32); padded key columns and
        # padded query rows are marked masked.
        mask8 = jnp.broadcast_to(attention_mask, (B, Sq, Sk)).astype(jnp.int8)
        if Sq_p != Sq or Sk_p != Sk:
            mask8 = jnp.pad(mask8, ((0, 0), (0, Sq_p - Sq), (0, Sk_p - Sk)),
                            constant_values=1)

        # Per-(b, q-tile, kv-tile) occupancy (any unmasked entry) and a redirection
        # table mapping each tile to the most recent occupied kv-tile index, so the
        # pipeline's k/v/mask DMAs are elided for skipped tiles (same block index
        # as the previous iteration => no copy).
        occ = (mask8.reshape(B, nq, tq, nk, tk) == 0).any(axis=(2, 4))   # (B,nq,nk)
        idx = jnp.arange(nk, dtype=jnp.int32)
        eff = jnp.where(occ, idx[None, None, :], jnp.int32(-1))
        eff = jnp.maximum(jax.lax.cummax(eff, axis=2), 0).astype(jnp.int32)
        occ_flat = occ.astype(jnp.int32).reshape(-1)
        eff_flat = eff.reshape(-1)

        kernel = functools.partial(_flash_attn_masked_kernel,
                                   compute_dtype=_COMPUTE_DTYPE)
        out = pl.pallas_call(
            kernel,
            out_shape=jax.ShapeDtypeStruct((B, Sq_p, Dv), out_dtype),
            grid_spec=pltpu.PrefetchScalarGridSpec(
                num_scalar_prefetch=2,
                grid=(B, nq, nk),
                in_specs=[
                    pl.BlockSpec((1, tq, D),
                                 lambda b, i, j, occ_r, eff_r: (b, i, 0)),
                    pl.BlockSpec((1, tk, D),
                                 lambda b, i, j, occ_r, eff_r:
                                     (b, eff_r[(b * nq + i) * nk + j], 0)),
                    pl.BlockSpec((1, tk, Dv),
                                 lambda b, i, j, occ_r, eff_r:
                                     (b, eff_r[(b * nq + i) * nk + j], 0)),
                    pl.BlockSpec((1, tq, tk),
                                 lambda b, i, j, occ_r, eff_r:
                                     (b, i, eff_r[(b * nq + i) * nk + j])),
                ],
                out_specs=pl.BlockSpec((1, tq, Dv),
                                       lambda b, i, j, occ_r, eff_r: (b, i, 0)),
                scratch_shapes=scratch_shapes),
            compiler_params=compiler_params,
        )(occ_flat, eff_flat, qs, ks, vs, mask8)

    if Sq_p != Sq:
        out = out[:, :Sq, :]
    return out


def _reference_attention(q, k, v, mask):
    d = k.shape[-1]
    scores = jnp.einsum("bqd,bkd->bqk", q, k) / jnp.sqrt(jnp.float32(d))
    if mask is not None:
        scores = jnp.where(mask, -jnp.inf, scores)
    probs = jax.nn.softmax(scores, axis=-1)
    return jnp.einsum("bqk,bkd->bqd", probs, v)


if __name__ == "__main__":
    key = jax.random.PRNGKey(0)
    kq, kk, kv_ = jax.random.split(key, 3)

    B, Sq, Sk, D, Dv = 2, 8, 8, 32, 32
    q = jax.random.normal(kq, (B, Sq, D), dtype=jnp.float32)
    k = jax.random.normal(kk, (B, Sk, D), dtype=jnp.float32)
    v = jax.random.normal(kv_, (B, Sk, Dv), dtype=jnp.float32)

    # Causal-style mask (True => masked with -inf); never masks a whole row.
    causal = jnp.triu(jnp.ones((Sq, Sk), dtype=jnp.bool_), k=1)
    attention_mask = jnp.broadcast_to(causal, (B, Sq, Sk))

    out_masked = jax.block_until_ready(
        attention_pallas(q, k, v, attention_mask, dropout=0.0))
    ref_masked = _reference_attention(q, k, v, attention_mask)
    assert out_masked.shape == (B, Sq, Dv)
    # bf16 MXU operands + approx reciprocal => looser tolerance than a pure-f32 ref.
    assert jnp.allclose(out_masked, ref_masked, atol=3e-2, rtol=3e-2), \
        "masked attention mismatch vs reference"

    out_nomask = jax.block_until_ready(
        attention_pallas(q, k, v, None, dropout=0.0))
    ref_nomask = _reference_attention(q, k, v, None)
    assert out_nomask.shape == (B, Sq, Dv)
    assert jnp.allclose(out_nomask, ref_nomask, atol=3e-2, rtol=3e-2), \
        "unmasked attention mismatch vs reference"

    print("KERNEL_OK")
</pallas_src>

<mosaic_0001>
module attributes {stable_mosaic.version = 11 : i64} {
  func.func @_flash_attn_masked_kernel(%arg0: i32, %arg1: i32, %arg2: i32, %arg3: memref<2xi32, #tpu.memory_space<smem>>, %arg4: memref<2xi32, #tpu.memory_space<smem>>, %arg5: memref<1x128x32xbf16, #tpu.memory_space<vmem>>, %arg6: memref<1x128x32xbf16, #tpu.memory_space<vmem>>, %arg7: memref<1x128x32xbf16, #tpu.memory_space<vmem>>, %arg8: memref<1x128x128xi8, #tpu.memory_space<vmem>>, %arg9: memref<1x128x32xf32, #tpu.memory_space<vmem>>, %arg10: memref<128x1xf32, #tpu.memory_space<vmem>>, %arg11: memref<128x1xf32, #tpu.memory_space<vmem>>, %arg12: memref<128x32xf32, #tpu.memory_space<vmem>>) attributes {dimension_semantics = [#tpu.dimension_semantics<parallel>, #tpu.dimension_semantics<parallel>, #tpu.dimension_semantics<arbitrary>], iteration_bounds = array<i64: 2, 1, 1>, scalar_prefetch = 2 : i64, scratch_operands = 3 : i64, tpu.core_type = #tpu.core_type<tc>, window_params = [{transform_indices = @transform_0, window_bounds = array<i64: 1, 128, 32>}, {transform_indices = @transform_1, window_bounds = array<i64: 1, 128, 32>}, {transform_indices = @transform_2, window_bounds = array<i64: 1, 128, 32>}, {transform_indices = @transform_3, window_bounds = array<i64: 1, 128, 128>}, {transform_indices = @transform_4, window_bounds = array<i64: 1, 128, 32>}]} {
    %c0_i32 = arith.constant 0 : i32
    %0 = arith.cmpi eq, %arg2, %c0_i32 : i32
    %1 = arith.extui %0 : i1 to i32
    %c0_i32_0 = arith.constant 0 : i32
    %2 = arith.cmpi ne, %1, %c0_i32_0 : i32
    scf.if %2 {
      %cst = arith.constant -1.000000e+30 : f32
      %15 = vector.broadcast %cst : f32 to vector<128x1xf32>
      %c0 = arith.constant 0 : index
      %c0_6 = arith.constant 0 : index
      %16 = vector.load %arg10[%c0, %c0_6] : memref<128x1xf32, #tpu.memory_space<vmem>>, vector<128x1xf32>
      tpu.vector_store %arg10[%c0, %c0_6], %15 {strides = array<i32>} : memref<128x1xf32, #tpu.memory_space<vmem>>, vector<128x1xf32>,
      %cst_7 = arith.constant 0.000000e+00 : f32
      %17 = vector.broadcast %cst_7 : f32 to vector<128x1xf32>
      %c0_8 = arith.constant 0 : index
      %c0_9 = arith.constant 0 : index
      %18 = vector.load %arg11[%c0_8, %c0_9] : memref<128x1xf32, #tpu.memory_space<vmem>>, vector<128x1xf32>
      tpu.vector_store %arg11[%c0_8, %c0_9], %17 {strides = array<i32>} : memref<128x1xf32, #tpu.memory_space<vmem>>, vector<128x1xf32>,
      %cst_10 = arith.constant 0.000000e+00 : f32
      %19 = vector.broadcast %cst_10 : f32 to vector<128x32xf32>
      %c0_11 = arith.constant 0 : index
      %c0_12 = arith.constant 0 : index
      %20 = vector.load %arg12[%c0_11, %c0_12] : memref<128x32xf32, #tpu.memory_space<vmem>>, vector<128x32xf32>
      tpu.vector_store %arg12[%c0_11, %c0_12], %19 {strides = array<i32>} : memref<128x32xf32, #tpu.memory_space<vmem>>, vector<128x32xf32>,
    } else {
    }
    %c1_i32 = arith.constant 1 : i32
    %3 = arith.muli %arg0, %c1_i32 : i32
    %4 = arith.addi %3, %arg1 : i32
    %c1_i32_1 = arith.constant 1 : i32
    %5 = arith.muli %4, %c1_i32_1 : i32
    %6 = arith.addi %5, %arg2 : i32
    %7 = arith.index_cast %6 : i32 to index
    %8 = memref.load %arg3[%7] : memref<2xi32, #tpu.memory_space<smem>>
    %c0_i32_2 = arith.constant 0 : i32
    %9 = arith.cmpi ne, %8, %c0_i32_2 : i32
    %10 = arith.extui %9 : i1 to i32
    %c0_i32_3 = arith.constant 0 : i32
    %11 = arith.cmpi ne, %10, %c0_i32_3 : i32
    scf.if %11 {
      %c0 = arith.constant 0 : index
      %c0_6 = arith.constant 0 : index
      %c0_7 = arith.constant 0 : index
      %15 = vector.load %arg5[%c0, %c0_6, %c0_7] : memref<1x128x32xbf16, #tpu.memory_space<vmem>>, vector<1x128x32xbf16>
      %16 = vector.shape_cast %15 : vector<1x128x32xbf16> to vector<128x32xbf16>
      %c0_8 = arith.constant 0 : index
      %c0_9 = arith.constant 0 : index
      %c0_10 = arith.constant 0 : index
      %17 = vector.load %arg6[%c0_8, %c0_9, %c0_10] : memref<1x128x32xbf16, #tpu.memory_space<vmem>>, vector<1x128x32xbf16>
      %18 = vector.shape_cast %17 : vector<1x128x32xbf16> to vector<128x32xbf16>
      %c0_11 = arith.constant 0 : index
      %c0_12 = arith.constant 0 : index
      %c0_13 = arith.constant 0 : index
      %19 = vector.load %arg7[%c0_11, %c0_12, %c0_13] : memref<1x128x32xbf16, #tpu.memory_space<vmem>>, vector<1x128x32xbf16>
      %20 = vector.shape_cast %19 : vector<1x128x32xbf16> to vector<128x32xbf16>
      %c0_14 = arith.constant 0 : index
      %c0_15 = arith.constant 0 : index
      %c0_16 = arith.constant 0 : index
      %21 = vector.load %arg8[%c0_14, %c0_15, %c0_16] : memref<1x128x128xi8, #tpu.memory_space<vmem>>, vector<1x128x128xi8>
      %22 = vector.shape_cast %21 : vector<1x128x128xi8> to vector<128x128xi8>
      %cst = arith.constant dense<0.000000e+00> : vector<128x128xf32>
      %23 = tpu.matmul %16, %18, %cst {dimension_numbers = #tpu.dot_dimension_numbers<[1], [1], [0], [0], [0, 0, 1, 0], [], []>} : vector<128x32xbf16>, vector<128x32xbf16>, vector<128x128xf32> -> vector<128x128xf32>
      %c0_i8 = arith.constant 0 : i8
      %24 = vector.broadcast %c0_i8 : i8 to vector<128x128xi8>
      %25 = arith.cmpi ne, %22, %24 : vector<128x128xi8>
      %cst_17 = arith.constant -1.000000e+30 : f32
      %26 = vector.broadcast %cst_17 : f32 to vector<128x128xf32>
      %27 = arith.select %25, %26, %23 : vector<128x128xi1>, vector<128x128xf32>
      %c0_18 = arith.constant 0 : index
      %c0_19 = arith.constant 0 : index
      %28 = vector.load %arg10[%c0_18, %c0_19] : memref<128x1xf32, #tpu.memory_space<vmem>>, vector<128x1xf32>
      %cst_20 = arith.constant dense<0xFF800000> : vector<128xf32>
      %29 = vector.multi_reduction <maximumf>, %27, %cst_20 [1] : vector<128x128xf32> to vector<128xf32>
      %30 = vector.shape_cast %29 : vector<128xf32> to vector<128x1xf32>
      %31 = arith.maximumf %28, %30 : vector<128x1xf32>
      %32 = arith.subf %28, %31 : vector<128x1xf32>
      %33 = math.exp %32 : vector<128x1xf32>
      %34 = vector.broadcast %31 : vector<128x1xf32> to vector<128x128xf32>
      %35 = arith.subf %27, %34 : vector<128x128xf32>
      %36 = math.exp %35 : vector<128x128xf32>
      %c0_21 = arith.constant 0 : index
      %c0_22 = arith.constant 0 : index
      %37 = vector.load %arg11[%c0_21, %c0_22] : memref<128x1xf32, #tpu.memory_space<vmem>>, vector<128x1xf32>
      %38 = arith.mulf %33, %37 : vector<128x1xf32>
      %cst_23 = arith.constant dense<0.000000e+00> : vector<128xf32>
      %39 = vector.multi_reduction <add>, %36, %cst_23 [1] : vector<128x128xf32> to vector<128xf32>
      %40 = vector.shape_cast %39 : vector<128xf32> to vector<128x1xf32>
      %41 = arith.addf %38, %40 : vector<128x1xf32>
      %c0_24 = arith.constant 0 : index
      %c0_25 = arith.constant 0 : index
      %42 = vector.load %arg11[%c0_24, %c0_25] : memref<128x1xf32, #tpu.memory_space<vmem>>, vector<128x1xf32>
      tpu.vector_store %arg11[%c0_24, %c0_25], %41 {strides = array<i32>} : memref<128x1xf32, #tpu.memory_space<vmem>>, vector<128x1xf32>,
      %c0_26 = arith.constant 0 : index
      %c0_27 = arith.constant 0 : index
      %43 = vector.load %arg12[%c0_26, %c0_27] : memref<128x32xf32, #tpu.memory_space<vmem>>, vector<128x32xf32>
      %44 = vector.broadcast %33 : vector<128x1xf32> to vector<128x32xf32>
      %45 = arith.mulf %44, %43 : vector<128x32xf32>
      %46 = arith.truncf %36 : vector<128x128xf32> to vector<128x128xbf16>
      %cst_28 = arith.constant dense<0.000000e+00> : vector<128x32xf32>
      %47 = tpu.matmul %46, %20, %cst_28 {dimension_numbers = #tpu.dot_dimension_numbers<[1], [0], [0], [1], [0, 0, 1, 1], [], []>} : vector<128x128xbf16>, vector<128x32xbf16>, vector<128x32xf32> -> vector<128x32xf32>
      %48 = arith.addf %45, %47 : vector<128x32xf32>
      %c0_29 = arith.constant 0 : index
      %c0_30 = arith.constant 0 : index
      %49 = vector.load %arg12[%c0_29, %c0_30] : memref<128x32xf32, #tpu.memory_space<vmem>>, vector<128x32xf32>
      tpu.vector_store %arg12[%c0_29, %c0_30], %48 {strides = array<i32>} : memref<128x32xf32, #tpu.memory_space<vmem>>, vector<128x32xf32>,
      %c0_31 = arith.constant 0 : index
      %c0_32 = arith.constant 0 : index
      %50 = vector.load %arg10[%c0_31, %c0_32] : memref<128x1xf32, #tpu.memory_space<vmem>>, vector<128x1xf32>
      tpu.vector_store %arg10[%c0_31, %c0_32], %31 {strides = array<i32>} : memref<128x1xf32, #tpu.memory_space<vmem>>, vector<128x1xf32>,
    } else {
    }
    %c0_i32_4 = arith.constant 0 : i32
    %12 = arith.cmpi eq, %arg2, %c0_i32_4 : i32
    %13 = arith.extui %12 : i1 to i32
    %c0_i32_5 = arith.constant 0 : i32
    %14 = arith.cmpi ne, %13, %c0_i32_5 : i32
    scf.if %14 {
      %c0 = arith.constant 0 : index
      %c0_6 = arith.constant 0 : index
      %15 = vector.load %arg11[%c0, %c0_6] : memref<128x1xf32, #tpu.memory_space<vmem>>, vector<128x1xf32>
      %cst = arith.constant 0.000000e+00 : f32
      %16 = vector.broadcast %cst : f32 to vector<128x1xf32>
      %17 = arith.cmpf oeq, %15, %16 : vector<128x1xf32>
      %cst_7 = arith.constant 1.000000e+00 : f32
      %18 = vector.broadcast %cst_7 : f32 to vector<128x1xf32>
      %19 = arith.select %17, %18, %15 : vector<128x1xi1>, vector<128x1xf32>
      %20 = tpu.reciprocal %19 {approx = true} : vector<128x1xf32> -> vector<128x1xf32>
      %c0_8 = arith.constant 0 : index
      %c0_9 = arith.constant 0 : index
      %21 = vector.load %arg12[%c0_8, %c0_9] : memref<128x32xf32, #tpu.memory_space<vmem>>, vector<128x32xf32>
      %22 = vector.broadcast %20 : vector<128x1xf32> to vector<128x32xf32>
      %23 = arith.mulf %21, %22 : vector<128x32xf32>
      %c0_10 = arith.constant 0 : index
      %c0_11 = arith.constant 0 : index
      %c0_12 = arith.constant 0 : index
      %24 = vector.load %arg9[%c0_10, %c0_11, %c0_12] : memref<1x128x32xf32, #tpu.memory_space<vmem>>, vector<1x128x32xf32>
      %25 = vector.shape_cast %24 : vector<1x128x32xf32> to vector<128x32xf32>
      %26 = vector.shape_cast %23 : vector<128x32xf32> to vector<1x128x32xf32>
      tpu.vector_store %arg9[%c0_10, %c0_11, %c0_12], %26 {strides = array<i32>} : memref<1x128x32xf32, #tpu.memory_space<vmem>>, vector<1x128x32xf32>,
    } else {
    }
    return
  }
  func.func @transform_0(%arg0: i32, %arg1: i32, %arg2: i32, %arg3: memref<2xi32, #tpu.memory_space<smem>>, %arg4: memref<2xi32, #tpu.memory_space<smem>>) -> (i32, i32, i32) {
    %c0_i32 = arith.constant 0 : i32
    %c0_i32_0 = arith.constant 0 : i32
    return %arg0, %arg1, %c0_i32 : i32, i32, i32
  }
  func.func @transform_1(%arg0: i32, %arg1: i32, %arg2: i32, %arg3: memref<2xi32, #tpu.memory_space<smem>>, %arg4: memref<2xi32, #tpu.memory_space<smem>>) -> (i32, i32, i32) {
    %c1_i32 = arith.constant 1 : i32
    %0 = arith.muli %arg0, %c1_i32 : i32
    %1 = arith.addi %0, %arg1 : i32
    %c1_i32_0 = arith.constant 1 : i32
    %2 = arith.muli %1, %c1_i32_0 : i32
    %3 = arith.addi %2, %arg2 : i32
    %4 = arith.index_cast %3 : i32 to index
    %5 = memref.load %arg4[%4] : memref<2xi32, #tpu.memory_space<smem>>
    %c0_i32 = arith.constant 0 : i32
    %c0_i32_1 = arith.constant 0 : i32
    return %arg0, %5, %c0_i32 : i32, i32, i32
  }
  func.func @transform_2(%arg0: i32, %arg1: i32, %arg2: i32, %arg3: memref<2xi32, #tpu.memory_space<smem>>, %arg4: memref<2xi32, #tpu.memory_space<smem>>) -> (i32, i32, i32) {
    %c1_i32 = arith.constant 1 : i32
    %0 = arith.muli %arg0, %c1_i32 : i32
    %1 = arith.addi %0, %arg1 : i32
    %c1_i32_0 = arith.constant 1 : i32
    %2 = arith.muli %1, %c1_i32_0 : i32
    %3 = arith.addi %2, %arg2 : i32
    %4 = arith.index_cast %3 : i32 to index
    %5 = memref.load %arg4[%4] : memref<2xi32, #tpu.memory_space<smem>>
    %c0_i32 = arith.constant 0 : i32
    %c0_i32_1 = arith.constant 0 : i32
    return %arg0, %5, %c0_i32 : i32, i32, i32
  }
  func.func @transform_3(%arg0: i32, %arg1: i32, %arg2: i32, %arg3: memref<2xi32, #tpu.memory_space<smem>>, %arg4: memref<2xi32, #tpu.memory_space<smem>>) -> (i32, i32, i32) {
    %c1_i32 = arith.constant 1 : i32
    %0 = arith.muli %arg0, %c1_i32 : i32
    %1 = arith.addi %0, %arg1 : i32
    %c1_i32_0 = arith.constant 1 : i32
    %2 = arith.muli %1, %c1_i32_0 : i32
    %3 = arith.addi %2, %arg2 : i32
    %4 = arith.index_cast %3 : i32 to index
    %5 = memref.load %arg4[%4] : memref<2xi32, #tpu.memory_space<smem>>
    %c0_i32 = arith.constant 0 : i32
    return %arg0, %arg1, %5 : i32, i32, i32
  }
  func.func @transform_4(%arg0: i32, %arg1: i32, %arg2: i32, %arg3: memref<2xi32, #tpu.memory_space<smem>>, %arg4: memref<2xi32, #tpu.memory_space<smem>>) -> (i32, i32, i32) {
    %c0_i32 = arith.constant 0 : i32
    %c0_i32_0 = arith.constant 0 : i32
    return %arg0, %arg1, %c0_i32 : i32, i32, i32
  }
}

</mosaic_0001>

<bundles_post_ra>
// kernel: tpu_custom_call.1
= control target key start
LH: loop header
LB: loop body
LE: loop exit
PB: predicated region body
PF: predicated region fallthrough
CT: control target
= control target key end

     0   :  { %s2931_s0 = inlined_call_operand.vmem [shape: s32[2], index: 0, kind: input, shape index: {}]   ;;  %s2932_s2 = inlined_call_operand.vmem [shape: bf16[2,128,32], index: 2, kind: input, shape index: {}]   ;;  %s2933_s3 = inlined_call_operand.vmem [shape: bf16[2,128,32], index: 3, kind: input, shape index: {}]   ;;  %s2934_s4 = inlined_call_operand.vmem [shape: bf16[2,128,32], index: 4, kind: input, shape index: {}]   ;;  %s2935_s5 = inlined_call_operand.vmem [shape: s8[2,128,128], index: 5, kind: input, shape index: {}]   ;;  %s2936_s6 = inlined_call_operand.vmem [shape: f32[2,128,32], index: 6, kind: output, shape index: {}]   ;;  %s2937_s1 = inlined_call_operand.vmem [shape: s32[2], index: 1, kind: input, shape index: {}]  }
   0x1   :  { %s11_s23 = sshll.u32 %s2931_s0, 4  ;;  %s15_s26 = sshll.u32 %s2937_s1, 4  ;;  %s12_s23 = int_to_ptr.vmem [resolvable:$true] %s11_s23  ;;  %s16_s26 = int_to_ptr.vmem [resolvable:$true] %s15_s26 }
   0x2   :  { %s2221_s27 = scalar_lea.vmem %s12_s23, 16  ;;  %p2226_p1 = scmp.lt.s32.totalorder %s12_s23, %s12_s23 }
   0x3   :  { %p2222_p0 = scmp.ne.s32.totalorder %s12_s23, %s2221_s27  ;;  %p2227_p2 = scmp.lt.s32.totalorder %s2221_s27, %s2221_s27 }
   0x5   :  { %p2228_p3 = por %p2227_p2, %p2226_p1 }
   0x7   :  { %p2229_p4 = pnand %p2228_p3, %p2222_p0 }
   0x9   :  { %2232 = shalt.err (!%p2229_p4)  }
   0xa   :  { %s2271_s28 = smov [#allocation6]   ;;  %s2233_s29 = scalar_lea.vmem %s16_s26, 16 }
   0xb   :  { %14 = dma.vmem_to_smem %s12_s23, 16, %s2271_s28, [#allocation5] }
   0xc   :  { %p2234_p5 = scmp.ne.s32.totalorder %s16_s26, %s2233_s29  ;;  %p2238_p6 = scmp.lt.s32.totalorder %s16_s26, %s16_s26 }
   0xd   :  { %p2239_p7 = scmp.lt.s32.totalorder %s2233_s29, %s2233_s29 }
   0xf   :  { %p2240_p8 = por %p2239_p7, %p2238_p6 }
  0x11   :  { %p2241_p9 = pnand %p2240_p8, %p2234_p5 }
  0x13   :  { %2244 = shalt.err (!%p2241_p9)  }
  0x14   :  { %s2272_s0 = smov [#allocation7]  }
  0x15   :  { %18 = dma.vmem_to_smem %s16_s26, 16, %s2272_s0, [#allocation5] }
  0x16   :  { %2257 = dma.done.wait [#allocation5], 32 }
  0x17   :  { %2258 = vsyncadd [#allocation5], 4294967264 }
  0x18   :  { %20 = sfence }
  0x19   :  { %s2318_s1 = smov 0   ;;  %s2320_s30 = smov 0  }
  0x1a   :  { %s2322_s7 = smov 0  }
  0x1b LB: > { %s45_s8 = sadd.s32 1, %s2265_s30  ;;  %p1913_p10 = scmp.ge.s32.totalorder %s2269_s7, 1  ;;  %s2269_s7 = sphi %s2322_s7, %s26_s7   ;;  %s2265_s30 = sphi %s2320_s30, %s2951_s30   ;;  %s2261_s1 = sphi %s2318_s1, %s2950_s1  }
  0x1c   : > { %p47_p11 = scmp.ge.s32.totalorder %s45_s8, 2  ;;  %p294_p12 = scmp.lt.s32.totalorder %s2269_s7, 3 }
  0x1e   : > { %s2953_s8 = smov (%p47_p11, %s45_s8), 0  ;;  %p295_p13 = pnand %p1913_p10, %p294_p12 }
  0x1f   : > { %p368_p0 = scmp.lt.s32.totalorder (!%p295_p13), %s2261_s1, 1  ;;  %s2340_s9 = sld [smem:[#allocation7 + %s2261_s1]] (!%p295_p13) }
  0x20   : > { %298 = sbr.rel (%p295_p13) target bundleno = 1022 (0x3fe), region = 36  ;;  %s2343_s10 = sld [smem:[#allocation7 + %s2261_s1]] (!%p295_p13) }
  0x21   : > { %s411_s12 = sld [smem:[#allocation7 + %s2261_s1]] (!%p295_p13) }
  0x22   : > { %s497_s15 = sld [smem:[#allocation6 + %s2261_s1]] (!%p295_p13) }
  0x25   : > { %vm445_vm0 = vcmask 7168   ;;  %v2273_v0 = vmov -1e+30   ;;  %v2274_v1 = vmov 0.0   ;;  %vm478_vm1 = vcmask 261120   ;;  %s2380_s11 = scalar_select %p368_p0, %s2261_s1, 1 }
  0x26   : > { %446 = vst.msk [vmem:[#allocation2] sm:$0xff] %vm445_vm0, %v2273_v0  ;;  %447 = vst.msk [vmem:[#allocation2 + $0x8] sm:$0xff] %vm445_vm0, %v2273_v0  ;;  %s1916_s19 = sshll.u32 %s2340_s9, 4  ;;  %s1919_s21 = sshll.u32 %s2343_s10, 4 }
  0x27   : > { %448 = vst.msk [vmem:[#allocation2 + $0x10] sm:$0xff] %vm445_vm0, %v2273_v0  ;;  %449 = vst.msk [vmem:[#allocation2 + $0x18] sm:$0xff] %vm445_vm0, %v2273_v0  ;;  %s1961_s13 = sshll.u32 %s2380_s11, 6  ;;  %s1917_s14 = sshll.u32 %s2380_s11, 4 }
  0x28   : > { %450 = vst.msk [vmem:[#allocation2 + $0x20] sm:$0xff] %vm445_vm0, %v2273_v0  ;;  %451 = vst.msk [vmem:[#allocation2 + $0x28] sm:$0xff] %vm445_vm0, %v2273_v0  ;;  %s2404_s17 = scalar_lea.vmem %s2932_s2, %s1961_s13  ;;  %s1922_s18 = sshll.u32 %s2380_s11, 2 }
  0x29   : > { %452 = vst.msk [vmem:[#allocation2 + $0x30] sm:$0xff] %vm445_vm0, %v2273_v0  ;;  %453 = vst.msk [vmem:[#allocation2 + $0x38] sm:$0xff] %vm445_vm0, %v2273_v0  ;;  %s1962_s20 = sshll.u32 %s2380_s11, 7  ;;  %p383_p1 = scmp.lt.s32.totalorder %s1916_s19, 15 }
  0x2a   : > { %454 = vst.msk [vmem:[#allocation2 + $0x40] sm:$0xff] %vm445_vm0, %v2273_v0  ;;  %455 = vst.msk [vmem:[#allocation2 + $0x48] sm:$0xff] %vm445_vm0, %v2273_v0  ;;  %p399_p2 = scmp.lt.s32.totalorder %s1919_s21, 15  ;;  %s2413_s24 = scalar_lea.vmem %s2936_s6, %s1962_s20 }
  0x2b   : > { %456 = vst.msk [vmem:[#allocation2 + $0x50] sm:$0xff] %vm445_vm0, %v2273_v0  ;;  %457 = vst.msk [vmem:[#allocation2 + $0x58] sm:$0xff] %vm445_vm0, %v2273_v0  ;;  %s2955_s19 = smov (!%p383_p1, %s1916_s19), 15  ;;  %p417_p3 = scmp.lt.s32.totalorder %s411_s12, 0 }
  0x2c   : > { %458 = vst.msk [vmem:[#allocation2 + $0x60] sm:$0xff] %vm445_vm0, %v2273_v0  ;;  %459 = vst.msk [vmem:[#allocation2 + $0x68] sm:$0xff] %vm445_vm0, %v2273_v0  ;;  %s2957_s21 = smov (!%p399_p2, %s1919_s21), 15  ;;  %s386_s25 = sadd.s32 %s1917_s14, %s2955_s19 }
  0x2d   : > { %460 = vst.msk [vmem:[#allocation2 + $0x70] sm:$0xff] %vm445_vm0, %v2273_v0  ;;  %461 = vst.msk [vmem:[#allocation2 + $0x78] sm:$0xff] %vm445_vm0, %v2273_v0  ;;  %s1918_s26 = sshll.u32 %s386_s25, 2  ;;  %s402_s27 = sadd.s32 %s1917_s14, %s2957_s21 }
  0x2e   : > { %462 = vst.msk [vmem:[#allocation3] sm:$0xff] %vm445_vm0, %v2274_v1  ;;  %463 = vst.msk [vmem:[#allocation3 + $0x8] sm:$0xff] %vm445_vm0, %v2274_v1  ;;  %s2418_s0 = scalar_lea.vmem %s2933_s3, %s1918_s26  ;;  %s1921_s9 = sshll.u32 %s402_s27, 2 }
  0x2f   : > { %464 = vst.msk [vmem:[#allocation3 + $0x10] sm:$0xff] %vm445_vm0, %v2274_v1  ;;  %465 = vst.msk [vmem:[#allocation3 + $0x18] sm:$0xff] %vm445_vm0, %v2274_v1  ;;  %s2423_s13 = scalar_lea.vmem %s2934_s4, %s1921_s9  ;;  %s2959_s12 = smov (!%p417_p3, %s411_s12), 0 }
  0x30   : > { %466 = vst.msk [vmem:[#allocation3 + $0x20] sm:$0xff] %vm445_vm0, %v2274_v1  ;;  %467 = vst.msk [vmem:[#allocation3 + $0x28] sm:$0xff] %vm445_vm0, %v2274_v1  ;;  %s421_s16 = sadd.s32 %s1922_s18, %s2959_s12  ;;  %p1926_p4 = scmp.eq.s32.totalorder %s497_s15, 0 }
  0x31   : > { %468 = vst.msk [vmem:[#allocation3 + $0x30] sm:$0xff] %vm445_vm0, %v2274_v1  ;;  %469 = vst.msk [vmem:[#allocation3 + $0x38] sm:$0xff] %vm445_vm0, %v2274_v1  ;;  %s1923_s20 = sshll.u32 %s421_s16, 3 }
  0x32   : > { %470 = vst.msk [vmem:[#allocation3 + $0x40] sm:$0xff] %vm445_vm0, %v2274_v1  ;;  %471 = vst.msk [vmem:[#allocation3 + $0x48] sm:$0xff] %vm445_vm0, %v2274_v1  ;;  %s2429_s23 = scalar_lea.vmem %s2935_s5, %s1923_s20 }
  0x33   : > { %472 = vst.msk [vmem:[#allocation3 + $0x50] sm:$0xff] %vm445_vm0, %v2274_v1  ;;  %473 = vst.msk [vmem:[#allocation3 + $0x58] sm:$0xff] %vm445_vm0, %v2274_v1 }
  0x34   : > { %474 = vst.msk [vmem:[#allocation3 + $0x60] sm:$0xff] %vm445_vm0, %v2274_v1  ;;  %475 = vst.msk [vmem:[#allocation3 + $0x68] sm:$0xff] %vm445_vm0, %v2274_v1 }
  0x35   : > { %476 = vst.msk [vmem:[#allocation3 + $0x70] sm:$0xff] %vm445_vm0, %v2274_v1  ;;  %477 = vst.msk [vmem:[#allocation3 + $0x78] sm:$0xff] %vm445_vm0, %v2274_v1 }
  0x36   : > { %479 = vst.msk [vmem:[#allocation4] sm:$0xff] %vm478_vm1, %v2274_v1  ;;  %480 = vst.msk [vmem:[#allocation4 + $0x8] sm:$0xff] %vm478_vm1, %v2274_v1 }
  0x37   : > { %481 = vst.msk [vmem:[#allocation4 + $0x10] sm:$0xff] %vm478_vm1, %v2274_v1  ;;  %482 = vst.msk [vmem:[#allocation4 + $0x18] sm:$0xff] %vm478_vm1, %v2274_v1 }
  0x38   : > { %483 = vst.msk [vmem:[#allocation4 + $0x20] sm:$0xff] %vm478_vm1, %v2274_v1  ;;  %484 = vst.msk [vmem:[#allocation4 + $0x28] sm:$0xff] %vm478_vm1, %v2274_v1 }
  0x39   : > { %485 = vst.msk [vmem:[#allocation4 + $0x30] sm:$0xff] %vm478_vm1, %v2274_v1  ;;  %486 = vst.msk [vmem:[#allocation4 + $0x38] sm:$0xff] %vm478_vm1, %v2274_v1  ;;  %501 = sbr.rel (%p1926_p4) target bundleno = 849 (0x351), region = 44 }
  0x3a   : > { %487 = vst.msk [vmem:[#allocation4 + $0x40] sm:$0xff] %vm478_vm1, %v2274_v1  ;;  %488 = vst.msk [vmem:[#allocation4 + $0x48] sm:$0xff] %vm478_vm1, %v2274_v1 }
  0x3b   : > { %489 = vst.msk [vmem:[#allocation4 + $0x50] sm:$0xff] %vm478_vm1, %v2274_v1  ;;  %490 = vst.msk [vmem:[#allocation4 + $0x58] sm:$0xff] %vm478_vm1, %v2274_v1 }
  0x3c   : > { %491 = vst.msk [vmem:[#allocation4 + $0x60] sm:$0xff] %vm478_vm1, %v2274_v1  ;;  %492 = vst.msk [vmem:[#allocation4 + $0x68] sm:$0xff] %vm478_vm1, %v2274_v1 }
  0x3d   : > { %493 = vst.msk [vmem:[#allocation4 + $0x70] sm:$0xff] %vm478_vm1, %v2274_v1  ;;  %494 = vst.msk [vmem:[#allocation4 + $0x78] sm:$0xff] %vm478_vm1, %v2274_v1 }
  0x3e   : > { %v2099_v2 = vld [vmem:[%s2418_s0 + $0x38] sm:$0xff]   ;;  %v2100_v3 = vld [vmem:[%s2418_s0 + $0x30] sm:$0xff]   ;;  %v2101_v5 = vld [vmem:[%s2418_s0 + $0x28] sm:$0xff]   ;;  %v2275_v26 = vmov 0  }
  0x3f   : > { %2059 = vmatprep.subr.msk.bf16.mxu0 %vm478_vm1, %v2099_v2  ;;  %v681_v4 = vsel %vm478_vm1, %v2099_v2, 0  ;;  %v678_v6 = vsel %vm478_vm1, %v2100_v3, 0  ;;  %v2107_v7 = vld [vmem:[%s2404_s17] sm:$0xff]   ;;  %v675_v8 = vsel %vm478_vm1, %v2101_v5, 0  ;;  %v2103_v11 = vld [vmem:[%s2418_s0 + $0x18] sm:$0xff]   ;;  %v2104_v13 = vld [vmem:[%s2418_s0 + $0x10] sm:$0xff]   ;;  %2098 = vset.pattern.permute.xlu1 %v2275_v26 }
  0x40   : > { %1996 = vmatpush3.bf16.xpose.msra.mxu0 %v681_v4  ;;  %2011 = vmatprep.mubr.msk.bf16.mxu0 %vm478_vm1, %v2107_v7  ;;  %v2102_v9 = vld [vmem:[%s2418_s0 + $0x20] sm:$0xff]   ;;  %v669_v12 = vsel %vm478_vm1, %v2103_v11, 0  ;;  %v666_v14 = vsel %vm478_vm1, %v2104_v13, 0  ;;  %v2105_v15 = vld [vmem:[%s2418_s0 + $0x8] sm:$0xff]   ;;  %v2109_v20 = vld [vmem:[%s2404_s17 + $0x10] sm:$0xff]  }
  0x41   : > { %2060 = vmatprep.subr.msk.bf16.mxu0 %vm478_vm1, %v2100_v3  ;;  %v672_v10 = vsel %vm478_vm1, %v2102_v9, 0  ;;  %v663_v16 = vsel %vm478_vm1, %v2105_v15, 0  ;;  %v2106_v17 = vld [vmem:[%s2418_s0] sm:$0xff]   ;;  %v2108_v19 = vld [vmem:[%s2404_s17 + $0x8] sm:$0xff]   ;;  %v2110_v21 = vld [vmem:[%s2404_s17 + $0x18] sm:$0xff]   ;;  %2097 = vset.pattern.permute.xlu0 %v2275_v26 }
  0x42   : > { %v660_v18 = vsel %vm478_vm1, %v2106_v17, 0  ;;  %v2111_v22 = vld [vmem:[%s2404_s17 + $0x20] sm:$0xff]   ;;  %v2112_v23 = vld [vmem:[%s2404_s17 + $0x28] sm:$0xff]   ;;  %v2113_v24 = vld [vmem:[%s2404_s17 + $0x30] sm:$0xff]  }
  0x43   : > { %v2114_v25 = vld [vmem:[%s2404_s17 + $0x38] sm:$0xff]   ;;  %v550_v27 = vld [vmem:[%s2429_s23] sm:$0xff]  ;;  %v551_v30 = vld [vmem:[%s2429_s23 + $0x8] sm:$0xff] }
  0x44   : > { %vm780_vm2 = vnez %v550_v27  ;;  %vm781_vm3 = vnez %v551_v30  ;;  %v552_v41 = vld [vmem:[%s2429_s23 + $0x10] sm:$0xff]  ;;  %v553_v57 = vld [vmem:[%s2429_s23 + $0x18] sm:$0xff] }
  0x45   : > { %v784_v28 = vsel %vm780_vm2, 16843009, %v2275_v26  ;;  %v785_v36 = vsel %vm781_vm3, 16843009, %v2275_v26  ;;  %vm782_vm4 = vnez %v552_v41  ;;  %vm783_vm10 = vnez %v553_v57 }
  0x46   : > { %v790_v29 = vunpack.c.2.s8 %v784_v28  ;;  %v788_v31 = vunpack.c.0.s8 %v784_v28  ;;  %v791_v33 = vunpack.c.3.s8 %v784_v28  ;;  %v789_v34 = vunpack.c.1.s8 %v784_v28 }
  0x47   : > { %v792_v40 = vunpack.c.0.s8 %v785_v36  ;;  %v795_v43 = vunpack.c.3.s8 %v785_v36  ;;  %v794_v44 = vunpack.c.2.s8 %v785_v36  ;;  %v786_v48 = vsel %vm782_vm4, 16843009, %v2275_v26 }
  0x48   : > { %1998 = vmatpush3.bf16.xpose.msra.mxu0 %v678_v6  ;;  %v808_v32 = vpack.c.b16 %v790_v29, %v790_v29  ;;  %v804_v35 = vpack.c.b16 %v788_v31, %v788_v31  ;;  %v810_v38 = vpack.c.b16 %v791_v33, %v791_v33  ;;  %v806_v39 = vpack.c.b16 %v789_v34, %v789_v34 }
  0x49   : > { %2061 = vmatprep.subr.msk.bf16.mxu0 %vm478_vm1, %v2101_v5  ;;  %v812_v47 = vpack.c.b16 %v792_v40, %v792_v40  ;;  %v818_v50 = vpack.c.b16 %v795_v43, %v795_v43  ;;  %v816_v51 = vpack.c.b16 %v794_v44, %v794_v44  ;;  %v793_v53 = vunpack.c.1.s8 %v785_v36 }
  0x4a   : > { %v809_v37 = vpack.c.b8 %v808_v32, %v808_v32  ;;  %v805_v42 = vpack.c.b8 %v804_v35, %v804_v35  ;;  %v811_v45 = vpack.c.b8 %v810_v38, %v810_v38  ;;  %v807_v46 = vpack.c.b8 %v806_v39, %v806_v39 }
  0x4b   : > { %v813_v52 = vpack.c.b8 %v812_v47, %v812_v47  ;;  %v796_v54 = vunpack.c.0.s8 %v786_v48  ;;  %v819_v60 = vpack.c.b8 %v818_v50, %v818_v50  ;;  %v817_v61 = vpack.c.b8 %v816_v51, %v816_v51 }
  0x4c   : > { %vm838_vm5 = vnez %v809_v37  ;;  %vm836_vm6 = vnez %v805_v42  ;;  %vm839_vm7 = vnez %v811_v45  ;;  %vm837_vm8 = vnez %v807_v46  ;;  %v2614_v46 = vld [vmem:[#allocation2 + $0x20] sm:$0xff] }
  0x4d   : > { %v854_v49 = vsel %vm838_vm5, 16843009, %v2275_v26  ;;  %v852_v56 = vsel %vm836_vm6, 16843009, %v2275_v26  ;;  %v855_v58 = vsel %vm839_vm7, 16843009, %v2275_v26  ;;  %vm840_vm9 = vnez %v813_v52 }
  0x4e   : > { %v870_v55 = vunpack.c.0.s8 %v854_v49  ;;  %v853_v59 = vsel %vm837_vm8, 16843009, %v2275_v26  ;;  %v814_v62 = vpack.c.b16 %v793_v53, %v793_v53  ;;  %v799_v63 = vunpack.c.3.s8 %v786_v48 }
  0x4f   : > { %v868_v0 = vunpack.c.0.s8 %v852_v56  ;;  %v820_v1 = vpack.c.b16 %v796_v54, %v796_v54  ;;  %v798_v2 = vunpack.c.2.s8 %v786_v48  ;;  %v871_v3 = vunpack.c.0.s8 %v855_v58 }
  0x50   : > { %2000 = vmatpush3.bf16.xpose.msra.mxu0 %v675_v8  ;;  %v869_v4 = vunpack.c.0.s8 %v853_v59  ;;  %vm886_vm11 = vcmp.ne.s32.totalorder %v870_v55, 0  ;;  %v856_v5 = vsel %vm840_vm9, 16843009, %v2275_v26  ;;  %vm2485_vm12 = vnez %v819_v60 }
  0x51   : > { %2062 = vmatprep.subr.msk.bf16.mxu0 %vm478_vm1, %v2102_v9  ;;  %vm2489_vm13 = vnez %v817_v61  ;;  %v815_v8 = vpack.c.b8 %v814_v62, %v814_v62  ;;  %v826_v9 = vpack.c.b16 %v799_v63, %v799_v63  ;;  %vm884_vm14 = vcmp.ne.s32.totalorder %v868_v0, 0 }
  0x52   : > { %vm2496_vm15 = vcmp.ne.s32.totalorder %v871_v3, 0  ;;  %vm2500_vm2 = vcmp.ne.s32.totalorder %v869_v4, 0 }
  0x53   : > { %vm841_vm3 = vnez %v815_v8 }
  0x54   : > { %v857_v36 = vsel %vm841_vm3, 16843009, %v2275_v26 }
  0x55   : > { %v873_v47 = vunpack.c.0.s8 %v857_v36  ;;  %v2590_v36 = vld [vmem:[#allocation2 + $0x18] sm:$0xff] }
  0x58   : > { %2002 = vmatpush3.bf16.xpose.msra.mxu0 %v672_v10  ;;  %v797_v10 = vunpack.c.1.s8 %v786_v48 }
  0x59   : > { %2063 = vmatprep.subr.msk.bf16.mxu0 %vm478_vm1, %v2103_v11  ;;  %v787_v11 = vsel %vm783_vm10, 16843009, %v2275_v26 }
  0x5a   : > { %v803_v29 = vunpack.c.3.s8 %v787_v11  ;;  %v802_v30 = vunpack.c.2.s8 %v787_v11  ;;  %v801_v44 = vunpack.c.1.s8 %v787_v11 }
  0x5c   : > { %v834_v42 = vpack.c.b16 %v803_v29, %v803_v29  ;;  %v832_v43 = vpack.c.b16 %v802_v30, %v802_v30  ;;  %v830_v56 = vpack.c.b16 %v801_v44, %v801_v44  ;;  %v2582_v29 = vld [vmem:[#allocation2 + $0x10] sm:$0xff]  ;;  %v2118_v44 = vld [vmem:[%s2423_s13 + $0x20] sm:$0xff]  }
  0x5d   : > { %v2116_v30 = vld [vmem:[%s2423_s13 + $0x30] sm:$0xff]  }
  0x5e   : > { %v835_v54 = vpack.c.b8 %v834_v42, %v834_v42  ;;  %v833_v55 = vpack.c.b8 %v832_v43, %v832_v43  ;;  %v831_v0 = vpack.c.b8 %v830_v56, %v830_v56  ;;  %v2632_v56 = vld [vmem:[#allocation2 + $0x28] sm:$0xff] }
  0x60   : > { %2004 = vmatpush3.bf16.xpose.msra.mxu0 %v669_v12 }
  0x61   : > { %2064 = vmatprep.subr.msk.bf16.mxu0 %vm478_vm1, %v2104_v13  ;;  %v821_v13 = vpack.c.b8 %v820_v1, %v820_v1 }
  0x63   : > { %vm844_vm4 = vnez %v821_v13 }
  0x64   : > { %v860_v39 = vsel %vm844_vm4, 16843009, %v2275_v26  ;;  %vm849_vm4 = vnez %v831_v0 }
  0x65   : > { %v876_v50 = vunpack.c.0.s8 %v860_v39 }
  0x68   : > { %2006 = vmatpush3.bf16.xpose.msra.mxu0 %v666_v14  ;;  %v824_v14 = vpack.c.b16 %v798_v2, %v798_v2 }
  0x69   : > { %2065 = vmatprep.subr.msk.bf16.mxu0 %vm478_vm1, %v2105_v15 }
  0x6a   : > { %v825_v28 = vpack.c.b8 %v824_v14, %v824_v14 }
  0x6c   : > { %vm846_vm7 = vnez %v825_v28  ;;  %v2115_v28 = vld [vmem:[%s2423_s13 + $0x38] sm:$0xff]  }
  0x6d   : > { %v862_v52 = vsel %vm846_vm7, 16843009, %v2275_v26  ;;  %2027 = vmatprep.subr.bf16.mxu1 %v2115_v28 }
  0x6e   : > { %v878_v60 = vunpack.c.0.s8 %v862_v52  ;;  %2028 = vmatpush3.bf16.msra.mxu1 %v2115_v28 }
  0x6f   : > { %2029 = vmatprep.subr.bf16.mxu1 %v2116_v30 }
  0x70   : > { %2008 = vmatpush3.bf16.xpose.msra.mxu0 %v663_v16  ;;  %vm894_vm3 = vcmp.ne.s32.totalorder %v878_v60, 0  ;;  %v865_v16 = vsel %vm849_vm4, 16843009, %v2275_v26 }
  0x71   : > { %2066 = vmatprep.subr.msk.bf16.mxu0 %vm478_vm1, %v2106_v17 }
  0x72   : > { %2030 = vmatpush3.bf16.msra.mxu1 %v2116_v30  ;;  %v2679_v30 = vld [vmem:[#allocation2 + $0x78] sm:$0xff] }
  0x78   : > { %2010 = vmatpush3.bf16.xpose.msra.mxu0 %v660_v18 }
  0x7f   : > { %2012 = vmatmul.mubr.msk.bf16.vlgmr.msra.gmra.mxu0 %vm478_vm1, %v2108_v19  ;;  %v872_v19 = vunpack.c.0.s8 %v856_v5 }
  0x80   : > { %2015 = vmatprep.mubr.msk.bf16.mxu0 %vm478_vm1, %v2109_v20  ;;  %v859_v20 = vsel %vm2485_vm12, 16843009, %v2275_v26 }
  0x81   : > { %vm2519_vm5 = vcmp.ne.s32.totalorder %v872_v19, 0  ;;  %v875_v35 = vunpack.c.0.s8 %v859_v20  ;;  %v881_v20 = vunpack.c.0.s8 %v865_v16 }
  0x83   : > { %vm891_vm8 = vcmp.ne.s32.totalorder %v875_v35, 0 }
  0x87   : > { %2016 = vmatmul.mubr.msk.bf16.gmra.mxu0 %vm478_vm1, %v2110_v21  ;;  %v858_v21 = vsel %vm2489_vm13, 16843009, %v2275_v26  ;;  %vm892_vm13 = vcmp.ne.s32.totalorder %v876_v50, 0  ;;  %v2119_v50 = vld [vmem:[%s2423_s13 + $0x18] sm:$0xff]  }
  0x88   : > { %2019 = vmatprep.mubr.msk.bf16.mxu0 %vm478_vm1, %v2111_v22  ;;  %v800_v22 = vunpack.c.0.s8 %v787_v11  ;;  %v874_v32 = vunpack.c.0.s8 %v858_v21 }
  0x8a   : > { %v828_v37 = vpack.c.b16 %v800_v22, %v800_v22  ;;  %vm2530_vm9 = vcmp.ne.s32.totalorder %v874_v32, 0 }
  0x8c   : > { %v829_v48 = vpack.c.b8 %v828_v37, %v828_v37  ;;  %v2117_v37 = vld [vmem:[%s2423_s13 + $0x28] sm:$0xff]  }
  0x8d   : > { %2031 = vmatprep.subr.bf16.mxu1 %v2117_v37 }
  0x8e   : > { %vm848_vm12 = vnez %v829_v48  ;;  %2032 = vmatpush3.bf16.msra.mxu1 %v2117_v37  ;;  %v2618_v48 = vld [vmem:[#allocation2 + $0x38] sm:$0xff]  ;;  %v2687_v37 = vld [vmem:[#allocation2 + $0x70] sm:$0xff] }
  0x8f   : > { %2020 = vmatmul.mubr.msk.bf16.gmra.mxu0 %vm478_vm1, %v2112_v23  ;;  %v864_v2 = vsel %vm848_vm12, 16843009, %v2275_v26  ;;  %2033 = vmatprep.subr.bf16.mxu1 %v2118_v44 }
  0x90   : > { %2023 = vmatprep.mubr.msk.bf16.mxu0 %vm478_vm1, %v2113_v24  ;;  %v827_v24 = vpack.c.b8 %v826_v9, %v826_v9  ;;  %v880_v9 = vunpack.c.0.s8 %v864_v2  ;;  %v2648_v2 = vld [vmem:[#allocation2 + $0x58] sm:$0xff] }
  0x92   : > { %vm847_vm6 = vnez %v827_v24  ;;  %2034 = vmatpush3.bf16.msra.mxu1 %v2118_v44 }
  0x93   : > { %v863_v51 = vsel %vm847_vm6, 16843009, %v2275_v26  ;;  %vm896_vm6 = vcmp.ne.s32.totalorder %v880_v9, 0  ;;  %2035 = vmatprep.subr.bf16.mxu1 %v2119_v50 }
  0x94   : > { %v879_v59 = vunpack.c.0.s8 %v863_v51 }
  0x96   : > { %2036 = vmatpush3.bf16.msra.mxu1 %v2119_v50 }
  0x97   : > { %2024 = vmatmul.mubr.msk.bf16.gmra.mxu0 %vm478_vm1, %v2114_v25  ;;  %v822_v25 = vpack.c.b16 %v797_v10, %v797_v10 }
  0x99   : > { %v823_v40 = vpack.c.b8 %v822_v25, %v822_v25 }
  0x9b   : > { %vm845_vm10 = vnez %v823_v40 }
  0x9c   : > { %v861_v62 = vsel %vm845_vm10, 16843009, %v2275_v26 }
  0x9d   : > { %v877_v4 = vunpack.c.0.s8 %v861_v62  ;;  %v2640_v62 = vld [vmem:[#allocation2 + $0x40] sm:$0xff] }
 0x13f   : > { %v2013_v12 = vpop.f32.mrf.mxu0 }
 0x140   : > { %v2494_v15 = vsel %vm886_vm11, -1e+30, %v2013_v12  ;;  %vm889_vm11 = vcmp.ne.s32.totalorder %v873_v47, 0 }
 0x141   : > { %936 = vmax.xlane.f32.xlu1 %v2494_v15  ;;  %v717_v18 = vpop.f32.mrf.mxu0 }
 0x142   : > { %v2511_v23 = vsel %vm884_vm14, -1e+30, %v717_v18  ;;  %vm851_vm14 = vnez %v835_v54 }
 0x143   : > { %932 = vmax.xlane.f32.xlu0 %v2511_v23  ;;  %v2014_v27 = vpop.f32.mrf.mxu0  ;;  %v867_v6 = vsel %vm851_vm14, 16843009, %v2275_v26 }
 0x144   : > { %v2516_v31 = vsel %vm2496_vm15, -1e+30, %v2014_v27  ;;  %vm850_vm15 = vnez %v833_v55  ;;  %v883_v13 = vunpack.c.0.s8 %v867_v6 }
 0x145   : > { %938 = vmax.xlane.f32.xlu1 %v2516_v31  ;;  %v720_v33 = vpop.f32.mrf.mxu0  ;;  %v866_v7 = vsel %vm850_vm15, 16843009, %v2275_v26 }
 0x146   : > { %v2526_v38 = vsel %vm2500_vm2, -1e+30, %v720_v33  ;;  %vm895_vm2 = vcmp.ne.s32.totalorder %v879_v59, 0  ;;  %v882_v14 = vunpack.c.0.s8 %v866_v7  ;;  %vm899_vm7 = vcmp.ne.s32.totalorder %v883_v13, 0  ;;  %v2585_v33 = vld [vmem:[#allocation2] sm:$0xff]  ;;  %v2656_v7 = vld [vmem:[#allocation2 + $0x50] sm:$0xff] }
 0x147   : > { %934 = vmax.xlane.f32.xlu0 %v2526_v38  ;;  %v2017_v41 = vpop.f32.mrf.mxu0  ;;  %v2664_v13 = vld [vmem:[#allocation2 + $0x48] sm:$0xff] }
 0x148   : > { %v2546_v61 = vsel %vm2530_vm9, -1e+30, %v2017_v41  ;;  %vm897_vm9 = vcmp.ne.s32.totalorder %v881_v20, 0  ;;  %v2599_v41 = vld [vmem:[#allocation2 + $0x8] sm:$0xff]  ;;  %v2673_v20 = vld [vmem:[#allocation2 + $0x60] sm:$0xff] }
 0x149   : > { %v733_v45 = vpop.f32.mrf.mxu0 }
 0x14a   : > { %v2536_v49 = vsel %vm2519_vm5, -1e+30, %v733_v45  ;;  %vm893_vm5 = vcmp.ne.s32.totalorder %v877_v4, 0 }
 0x14b   : > { %940 = vmax.xlane.f32.xlu0 %v2536_v49  ;;  %v2018_v53 = vpop.f32.mrf.mxu0 }
 0x14c   : > { %v2541_v57 = vsel %vm891_vm8, -1e+30, %v2018_v53  ;;  %vm898_vm8 = vcmp.ne.s32.totalorder %v882_v14, 0  ;;  %v2625_v53 = vld [vmem:[#allocation2 + $0x30] sm:$0xff]  ;;  %v2122_v14 = vld [vmem:[%s2423_s13] sm:$0xff]  }
 0x14d   : > { %946 = vmax.xlane.f32.xlu1 %v2541_v57  ;;  %v736_v58 = vpop.f32.mrf.mxu0 }
 0x14e   : > { %v2550_v1 = vsel %vm889_vm11, -1e+30, %v736_v58  ;;  %v2120_v58 = vld [vmem:[%s2423_s13 + $0x10] sm:$0xff]  }
 0x14f   : > { %944 = vmax.xlane.f32.xlu0 %v2546_v61  ;;  %v2021_v63 = vpop.f32.mrf.mxu0  ;;  %2037 = vmatprep.subr.bf16.mxu1 %v2120_v58 }
 0x150   : > { %v2561_v11 = vsel %vm894_vm3, -1e+30, %v2021_v63  ;;  %2038 = vmatpush3.bf16.msra.mxu1 %v2120_v58 }
 0x151   : > { %942 = vmax.xlane.f32.xlu1 %v2550_v1  ;;  %v749_v3 = vpop.f32.mrf.mxu0 }
 0x152   : > { %v2554_v5 = vsel %vm892_vm13, -1e+30, %v749_v3  ;;  %v2121_v3 = vld [vmem:[%s2423_s13 + $0x8] sm:$0xff]  }
 0x153   : > { %948 = vmax.xlane.f32.xlu0 %v2554_v5  ;;  %v2022_v8 = vpop.f32.mrf.mxu0  ;;  %2039 = vmatprep.subr.bf16.mxu1 %v2121_v3 }
 0x154   : > { %v2559_v10 = vsel %vm895_vm2, -1e+30, %v2022_v8  ;;  %2040 = vmatpush3.bf16.msra.mxu1 %v2121_v3 }
 0x155   : > { %954 = vmax.xlane.f32.xlu1 %v2559_v10  ;;  %v752_v12 = vpop.f32.mrf.mxu0  ;;  %2041 = vmatprep.subr.bf16.mxu1 %v2122_v14 }
 0x156   : > { %v2566_v18 = vsel %vm893_vm5, -1e+30, %v752_v12 }
 0x157   : > { %952 = vmax.xlane.f32.xlu0 %v2561_v11  ;;  %v2025_v17 = vpop.f32.mrf.mxu0 }
 0x158   : > { %v2574_v24 = vsel %vm898_vm8, -1e+30, %v2025_v17  ;;  %2042 = vmatpush3.bf16.msra.mxu1 %v2122_v14 }
 0x159   : > { %950 = vmax.xlane.f32.xlu1 %v2566_v18  ;;  %v765_v19 = vpop.f32.mrf.mxu0 }
 0x15a   : > { %v2569_v21 = vsel %vm896_vm6, -1e+30, %v765_v19 }
 0x15b   : > { %956 = vmax.xlane.f32.xlu0 %v2569_v21  ;;  %v2026_v22 = vpop.f32.mrf.mxu0 }
 0x15c   : > { %v2572_v26 = vsel %vm899_vm7, -1e+30, %v2026_v22 }
 0x15d   : > { %962 = vmax.xlane.f32.xlu1 %v2572_v26  ;;  %v768_v25 = vpop.f32.mrf.mxu0 }
 0x15e   : > { %v2578_v27 = vsel %vm897_vm9, -1e+30, %v768_v25 }
 0x15f   : > { %960 = vmax.xlane.f32.xlu0 %v2574_v24 }
 0x161   : > { %958 = vmax.xlane.f32.xlu1 %v2578_v27 }
 0x1ca   : > { %v937_v32 = vpop.xlane.xlu1 %936 }
 0x1cb   : > { %v2588_v34 = vmax.f32 %v2582_v29, %v937_v32 }
 0x1cc   : > { %v933_v35 = vpop.xlane.xlu0 %932 }
 0x1cd   : > { %1552 = vst.msk [vmem:[#allocation2 + $0x10] sm:$0xff] %vm445_vm0, %v2588_v34  ;;  %v2596_v39 = vmax.f32 %v2585_v33, %v933_v35  ;;  %1040 = vperm.xlu1 %2098, %v2588_v34  }
 0x1ce   : > { %v939_v40 = vpop.xlane.xlu1 %938 }
 0x1cf   : > { %1550 = vst.msk [vmem:[#allocation2] sm:$0xff] %vm445_vm0, %v2596_v39  ;;  %v2604_v42 = vmax.f32 %v2590_v36, %v939_v40  ;;  %1030 = vperm.xlu0 %2097, %v2596_v39   ;;  %v980_v8 = vsub.f32 %v2585_v33, %v2596_v39 }
 0x1d0   : > { %v935_v43 = vpop.xlane.xlu0 %934 }
 0x1d1   : > { %1553 = vst.msk [vmem:[#allocation2 + $0x18] sm:$0xff] %vm445_vm0, %v2604_v42  ;;  %v2611_v45 = vmax.f32 %v2599_v41, %v935_v43  ;;  %1045 = vperm.xlu1 %2098, %v2604_v42   ;;  %v983_v17 = vsub.f32 %v2590_v36, %v2604_v42  ;;  %v996_v22 = vmul.f32 1.442695, %v980_v8  ;;  %v929_v42 = vld [vmem:[#allocation2 + $0x68] sm:$0xff]  ;;  %v982_v43 = vsub.f32 %v2582_v29, %v2588_v34 }
 0x1d3   : > { %1551 = vst.msk [vmem:[#allocation2 + $0x8] sm:$0xff] %vm445_vm0, %v2611_v45  ;;  %v981_v32 = vsub.f32 %v2599_v41, %v2611_v45  ;;  %v1002_v35 = vmul.f32 1.442695, %v983_v17  ;;  %2123 = vpow2.f32 %v996_v22 }
 0x1d4   : > { %v941_v47 = vpop.xlane.xlu0 %940 }
 0x1d5   : > { %v2622_v51 = vmax.f32 %v2614_v46, %v941_v47  ;;  %1035 = vperm.xlu1 %2098, %v2611_v45   ;;  %v998_v44 = vmul.f32 1.442695, %v981_v32  ;;  %2125 = vpow2.f32 %v1002_v35 }
 0x1d6   : > { %v947_v52 = vpop.xlane.xlu1 %946 }
 0x1d7   : > { %1554 = vst.msk [vmem:[#allocation2 + $0x20] sm:$0xff] %vm445_vm0, %v2622_v51  ;;  %v2630_v54 = vmax.f32 %v2618_v48, %v947_v52  ;;  %2127 = vpow2.f32 %v998_v44 }
 0x1d8   : > { %v945_v55 = vpop.xlane.xlu0 %944 }
 0x1d9   : > { %1557 = vst.msk [vmem:[#allocation2 + $0x38] sm:$0xff] %vm445_vm0, %v2630_v54  ;;  %v2638_v59 = vmax.f32 %v2625_v53, %v945_v55  ;;  %v987_v39 = vsub.f32 %v2618_v48, %v2630_v54  ;;  %v984_v55 = vsub.f32 %v2614_v46, %v2622_v51 }
 0x1da   : > { %v943_v60 = vpop.xlane.xlu1 %942 }
 0x1db   : > { %1556 = vst.msk [vmem:[#allocation2 + $0x30] sm:$0xff] %vm445_vm0, %v2638_v59  ;;  %v2645_v63 = vmax.f32 %v2632_v56, %v943_v60  ;;  %1060 = vperm.xlu1 %2098, %v2638_v59   ;;  %v1010_v50 = vmul.f32 1.442695, %v987_v39  ;;  %v1004_v60 = vmul.f32 1.442695, %v984_v55 }
 0x1dc   : > { %v949_v0 = vpop.xlane.xlu0 %948 }
 0x1dd   : > { %1555 = vst.msk [vmem:[#allocation2 + $0x28] sm:$0xff] %vm445_vm0, %v2645_v63  ;;  %v2654_v4 = vmax.f32 %v2640_v62, %v949_v0  ;;  %v985_v52 = vsub.f32 %v2632_v56, %v2645_v63  ;;  %2129 = vpow2.f32 %v1010_v50 }
 0x1de   : > { %v955_v6 = vpop.xlane.xlu1 %954 }
 0x1df   : > { %1558 = vst.msk [vmem:[#allocation2 + $0x40] sm:$0xff] %vm445_vm0, %v2654_v4  ;;  %v975_v9 = vmax.f32 %v2648_v2, %v955_v6  ;;  %1050 = vperm.xlu1 %2098, %v2622_v51   ;;  %v1006_v58 = vmul.f32 1.442695, %v985_v52  ;;  %v988_v8 = vsub.f32 %v2640_v62, %v2654_v4 }
 0x1e0   : > { %v953_v12 = vpop.xlane.xlu0 %952  ;;  %v2723_v51 = vpop.eup %2123 }
 0x1e1   : > { %1561 = vst.msk [vmem:[#allocation2 + $0x58] sm:$0xff] %vm445_vm0, %v975_v9  ;;  %v2669_v16 = vmax.f32 %v2656_v7, %v953_v12  ;;  %v991_v56 = vsub.f32 %v2648_v2, %v975_v9  ;;  %v1012_v14 = vmul.f32 1.442695, %v988_v8 }
 0x1e2   : > { %v951_v19 = vpop.xlane.xlu1 %950  ;;  %v2728_v6 = vpop.eup %2125 }
 0x1e3   : > { %1560 = vst.msk [vmem:[#allocation2 + $0x50] sm:$0xff] %vm445_vm0, %v2669_v16  ;;  %v973_v25 = vmax.f32 %v2664_v13, %v951_v19  ;;  %1055 = vperm.xlu1 %2098, %v2645_v63   ;;  %v986_v63 = vsub.f32 %v2625_v53, %v2638_v59  ;;  %v1018_v0 = vmul.f32 1.442695, %v991_v56  ;;  %v990_v2 = vsub.f32 %v2656_v7, %v2669_v16 }
 0x1e4   : > { %v957_v28 = vpop.xlane.xlu0 %956  ;;  %v2734_v12 = vpop.eup %2127 }
 0x1e5   : > { %1559 = vst.msk [vmem:[#allocation2 + $0x48] sm:$0xff] %vm445_vm0, %v973_v25  ;;  %v2685_v33 = vmax.f32 %v2673_v20, %v957_v28  ;;  %1075 = vperm.xlu0 %2097, %v973_v25   ;;  %v989_v46 = vsub.f32 %v2664_v13, %v973_v25  ;;  %v1008_v3 = vmul.f32 1.442695, %v986_v63 }
 0x1e6   : > { %v963_v36 = vpop.xlane.xlu1 %962 }
 0x1e7   : > { %1562 = vst.msk [vmem:[#allocation2 + $0x60] sm:$0xff] %vm445_vm0, %v2685_v33  ;;  %v2694_v40 = vmax.f32 %v2679_v30, %v963_v36  ;;  %1065 = vperm.xlu1 %2098, %v2630_v54   ;;  %v1000_v54 = vmul.f32 1.442695, %v982_v43  ;;  %v1014_v53 = vmul.f32 1.442695, %v989_v46 }
 0x1e8   : > { %v961_v41 = vpop.xlane.xlu0 %960 }
 0x1e9   : > { %v995_v45 = vsub.f32 %v2679_v30, %v2694_v40  ;;  %1565 = vst.msk [vmem:[#allocation2 + $0x78] sm:$0xff] %vm445_vm0, %v2694_v40  ;;  %v2704_v47 = vmax.f32 %v2687_v37, %v961_v41  ;;  %1085 = vperm.xlu0 %2097, %v975_v9   ;;  %2131 = vpow2.f32 %v1000_v54  ;;  %v1016_v9 = vmul.f32 1.442695, %v990_v2 }
 0x1ea   : > { %v959_v48 = vpop.xlane.xlu1 %958  ;;  %2133 = vpow2.f32 %v1006_v58  ;;  %v2737_v13 = vpop.eup %2129 }
 0x1eb   : > { %v994_v29 = vsub.f32 %v2687_v37, %v2704_v47  ;;  %1564 = vst.msk [vmem:[#allocation2 + $0x70] sm:$0xff] %vm445_vm0, %v2704_v47  ;;  %v977_v34 = vmax.f32 %v929_v42, %v959_v48  ;;  %1070 = vperm.xlu1 %2098, %v2654_v4   ;;  %2135 = vpow2.f32 %v1004_v60 }
 0x1ec   : > { %2137 = vpow2.f32 %v1018_v0 }
 0x1ed   : > { %1563 = vst.msk [vmem:[#allocation2 + $0x68] sm:$0xff] %vm445_vm0, %v977_v34  ;;  %1095 = vperm.xlu0 %2097, %v977_v34   ;;  %v993_v59 = vsub.f32 %v929_v42, %v977_v34  ;;  %2139 = vpow2.f32 %v1008_v3 }
 0x1ee   : > { %2141 = vpow2.f32 %v1014_v53 }
 0x1ef   : > { %1080 = vperm.xlu1 %2098, %v2669_v16   ;;  %v1022_v7 = vmul.f32 1.442695, %v993_v59  ;;  %2143 = vpow2.f32 %v1016_v9  ;;  %v992_v16 = vsub.f32 %v2673_v20, %v2685_v33 }
 0x1f1   : > { %1105 = vperm.xlu0 %2097, %v2694_v40   ;;  %2145 = vpow2.f32 %v1022_v7  ;;  %v1020_v4 = vmul.f32 1.442695, %v992_v16 }
 0x1f2   : > { %2147 = vpow2.f32 %v1012_v14 }
 0x1f3   : > { %1090 = vperm.xlu1 %2098, %v2685_v33   ;;  %2149 = vpow2.f32 %v1020_v4 }
 0x1f5   : > { %1271 = vperm.xlu0 %2097, %v2723_v51  }
 0x1f6   : > { %v2742_v17 = vpop.eup %2131 }
 0x1f7   : > { %1100 = vperm.xlu1 %2098, %v2704_v47   ;;  %v2745_v62 = vpop.eup %2133 }
 0x1f8   : > { %v2748_v19 = vpop.eup %2135 }
 0x1f9   : > { %1286 = vperm.xlu0 %2097, %v2728_v6   ;;  %v2751_v22 = vpop.eup %2137 }
 0x1fa   : > { %v2754_v20 = vpop.eup %2139 }
 0x1fb   : > { %1276 = vperm.xlu1 %2098, %v2734_v12   ;;  %v2757_v25 = vpop.eup %2141 }
 0x1fc   : > { %v2760_v28 = vpop.eup %2143 }
 0x1fd   : > { %1306 = vperm.xlu0 %2097, %v2737_v13  }
 0x1fe   : > { %v2763_v32 = vpop.eup %2145 }
 0x1ff   : > { %1281 = vperm.xlu1 %2098, %v2742_v17   ;;  %v2766_v33 = vpop.eup %2147 }
 0x200   : > { %v2769_v35 = vpop.eup %2149 }
 0x201   : > { %1296 = vperm.xlu0 %2097, %v2745_v62  }
 0x203   : > { %1291 = vperm.xlu1 %2098, %v2748_v19  }
 0x205   : > { %1326 = vperm.xlu0 %2097, %v2751_v22  }
 0x207   : > { %1301 = vperm.xlu1 %2098, %v2754_v20  }
 0x209   : > { %1316 = vperm.xlu0 %2097, %v2757_v25  }
 0x20b   : > { %1321 = vperm.xlu1 %2098, %v2760_v28  }
 0x20d   : > { %1336 = vperm.xlu0 %2097, %v2763_v32  }
 0x20f   : > { %1311 = vperm.xlu1 %2098, %v2766_v33  }
 0x213   : > { %1331 = vperm.xlu1 %2098, %v2769_v35  }
 0x248   : > { %v1041_v36 = vpop.permute.xlu1 %1040 }
 0x249   : > { %v1110_v39 = vsub.f32 %v2494_v15, %v1041_v36 }
 0x24a   : > { %v1031_v41 = vpop.permute.xlu0 %1030 }
 0x24b   : > { %v1128_v42 = vmul.f32 1.442695, %v1110_v39  ;;  %v1108_v43 = vsub.f32 %v2511_v23, %v1031_v41 }
 0x24c   : > { %v1046_v44 = vpop.permute.xlu1 %1045 }
 0x24d   : > { %2151 = vpow2.f32 %v1128_v42  ;;  %v1124_v48 = vmul.f32 1.442695, %v1108_v43  ;;  %v1111_v50 = vsub.f32 %v2516_v31, %v1046_v44 }
 0x24f   : > { %2153 = vpow2.f32 %v1124_v48  ;;  %v1130_v52 = vmul.f32 1.442695, %v1111_v50 }
 0x250   : > { %v1036_v34 = vpop.permute.xlu1 %1035 }
 0x251   : > { %v1109_v54 = vsub.f32 %v2526_v38, %v1036_v34  ;;  %2155 = vpow2.f32 %v1130_v52 }
 0x253   : > { %v1126_v55 = vmul.f32 1.442695, %v1109_v54 }
 0x255   : > { %2157 = vpow2.f32 %v1126_v55 }
 0x256   : > { %v1061_v58 = vpop.permute.xlu1 %1060 }
 0x257   : > { %v1114_v15 = vsub.f32 %v2546_v61, %v1061_v58 }
 0x259   : > { %v1136_v56 = vmul.f32 1.442695, %v1114_v15 }
 0x25a   : > { %v2152_v60 = vpop.eup %2151  ;;  %v1051_v63 = vpop.permute.xlu1 %1050 }
 0x25b   : > { %2159 = vpow2.f32 %v1136_v56  ;;  %v1112_v23 = vsub.f32 %v2536_v49, %v1051_v63  ;;  %1192 = vadd.xlane.f32.xlu0 %v2152_v60 }
 0x25c   : > { %v2154_v0 = vpop.eup %2153 }
 0x25d   : > { %v1132_v31 = vmul.f32 1.442695, %v1112_v23  ;;  %1188 = vadd.xlane.f32.xlu1 %v2154_v0 }
 0x25e   : > { %v1056_v46 = vpop.permute.xlu1 %1055  ;;  %v2156_v3 = vpop.eup %2155 }
 0x25f   : > { %2161 = vpow2.f32 %v1132_v31  ;;  %v1113_v38 = vsub.f32 %v2550_v1, %v1056_v46  ;;  %v1366_v14 = vpack.c.bf16 %v2156_v3, %v2152_v60 }
 0x260   : > { %v1076_v2 = vpop.permute.xlu0 %1075 }
 0x261   : > { %v1134_v53 = vmul.f32 1.442695, %v1113_v38  ;;  %1194 = vadd.xlane.f32.xlu1 %v2156_v3  ;;  %v1117_v61 = vsub.f32 %v2566_v18, %v1076_v2 }
 0x262   : > { %v2158_v59 = vpop.eup %2157  ;;  %v1066_v8 = vpop.permute.xlu1 %1065 }
 0x263   : > { %2163 = vpow2.f32 %v1134_v53  ;;  %v1115_v9 = vsub.f32 %v2541_v57, %v1066_v8  ;;  %1190 = vadd.xlane.f32.xlu0 %v2158_v59  ;;  %v1365_v49 = vpack.c.bf16 %v2158_v59, %v2154_v0  ;;  %v1142_v4 = vmul.f32 1.442695, %v1117_v61 }
 0x264   : > { %v1086_v7 = vpop.permute.xlu0 %1085 }
 0x265   : > { %v1138_v16 = vmul.f32 1.442695, %v1115_v9  ;;  %2043 = vmatprep.mubr.bf16.mxu1 %v1365_v49  ;;  %v1119_v1 = vsub.f32 %v2559_v10, %v1086_v7  ;;  %v1024_v9 = vmul.f32 1.442695, %v994_v29  ;;  %v1026_v49 = vmul.f32 1.442695, %v995_v45 }
 0x266   : > { %2044 = vmatmul.mubr.bf16.vlgmr.msra.gmra.mxu1 %v1366_v14  ;;  %v1071_v36 = vpop.permute.xlu1 %1070 }
 0x267   : > { %2165 = vpow2.f32 %v1138_v16  ;;  %v1116_v39 = vsub.f32 %v2554_v5, %v1071_v36  ;;  %v1146_v57 = vmul.f32 1.442695, %v1119_v1 }
 0x268   : > { %v2160_v41 = vpop.eup %2159  ;;  %v1096_v18 = vpop.permute.xlu0 %1095  ;;  %2167 = vpow2.f32 %v1142_v4 }
 0x269   : > { %v1140_v42 = vmul.f32 1.442695, %v1116_v39  ;;  %1200 = vadd.xlane.f32.xlu0 %v2160_v41  ;;  %v1121_v43 = vsub.f32 %v2578_v27, %v1096_v18 }
 0x26a   : > { %v1081_v44 = vpop.permute.xlu1 %1080 }
 0x26b   : > { %2169 = vpow2.f32 %v1140_v42  ;;  %v1118_v48 = vsub.f32 %v2561_v11, %v1081_v44  ;;  %v1150_v34 = vmul.f32 1.442695, %v1121_v43  ;;  %v1158_v42 = vld [vmem:[#allocation3 + $0x10] sm:$0xff]  ;;  %v1156_v43 = vld [vmem:[#allocation3] sm:$0xff] }
 0x26c   : > { %v2162_v50 = vpop.eup %2161  ;;  %v1106_v52 = vpop.permute.xlu0 %1105  ;;  %2171 = vpow2.f32 %v1146_v57  ;;  %v1174_v44 = vmul.f32 %v2742_v17, %v1158_v42 }
 0x26d   : > { %v1144_v10 = vmul.f32 1.442695, %v1118_v48  ;;  %1196 = vadd.xlane.f32.xlu0 %v2162_v50  ;;  %v1123_v5 = vsub.f32 %v2572_v26, %v1106_v52  ;;  %v1172_v52 = vmul.f32 %v2723_v51, %v1156_v43 }
 0x26e   : > { %v1091_v54 = vpop.permute.xlu1 %1090 }
 0x26f   : > { %2173 = vpow2.f32 %v1144_v10  ;;  %v1120_v55 = vsub.f32 %v2569_v21, %v1091_v54  ;;  %v1154_v27 = vmul.f32 1.442695, %v1123_v5  ;;  %v1157_v54 = vld [vmem:[#allocation3 + $0x8] sm:$0xff] }
 0x270   : > { %v2164_v58 = vpop.eup %2163  ;;  %2175 = vpow2.f32 %v1150_v34  ;;  %v2800_v16 = vpop.permute.xlu0 %1271  ;;  %v1159_v34 = vld [vmem:[#allocation3 + $0x18] sm:$0xff] }
 0x271   : > { %v1148_v15 = vmul.f32 1.442695, %v1120_v55  ;;  %v1367_v56 = vpack.c.bf16 %v2164_v58, %v2162_v50  ;;  %v1175_v55 = vmul.f32 %v2728_v6, %v1159_v34 }
 0x272   : > { %v1101_v60 = vpop.permute.xlu1 %1100 }
 0x273   : > { %2177 = vpow2.f32 %v1148_v15  ;;  %v1122_v11 = vsub.f32 %v2574_v24, %v1101_v60  ;;  %2047 = vmatprep.mubr.bf16.mxu1 %v1367_v56  ;;  %v1173_v56 = vmul.f32 %v2734_v12, %v1157_v54  ;;  %v1162_v60 = vld [vmem:[#allocation3 + $0x30] sm:$0xff]  ;;  %v1163_v12 = vld [vmem:[#allocation3 + $0x38] sm:$0xff] }
 0x274   : > { %v2166_v63 = vpop.eup %2165  ;;  %2179 = vpow2.f32 %v1154_v27  ;;  %v2804_v47 = vpop.permute.xlu0 %1286  ;;  %v1178_v51 = vmul.f32 %v2754_v20, %v1162_v60 }
 0x275   : > { %v1152_v23 = vmul.f32 1.442695, %v1122_v11  ;;  %1202 = vadd.xlane.f32.xlu1 %v2166_v63  ;;  %v1368_v0 = vpack.c.bf16 %v2166_v63, %v2160_v41  ;;  %v2168_v26 = vpop.eup %2167  ;;  %v1160_v63 = vld [vmem:[#allocation3 + $0x20] sm:$0xff] }
 0x276   : > { %v2802_v37 = vpop.permute.xlu1 %1276  ;;  %v1176_v6 = vmul.f32 %v2748_v19, %v1160_v63  ;;  %v1256_v63 = vld [vmem:[#allocation4 + $0x18] sm:$0xff] }
 0x277   : > { %2181 = vpow2.f32 %v1152_v23  ;;  %2048 = vmatmul.mubr.bf16.gmra.mxu1 %v1368_v0 }
 0x278   : > { %v2170_v31 = vpop.eup %2169  ;;  %2183 = vpow2.f32 %v1024_v9  ;;  %v2808_v4 = vpop.permute.xlu0 %1306  ;;  %v1165_v9 = vld [vmem:[#allocation3 + $0x48] sm:$0xff] }
 0x279   : > { %1198 = vadd.xlane.f32.xlu1 %v2164_v58  ;;  %v1369_v21 = vpack.c.bf16 %v2168_v26, %v2170_v31  ;;  %v2172_v46 = vpop.eup %2171  ;;  %2185 = vpow2.f32 %v1026_v49  ;;  %v1181_v43 = vmul.f32 %v2757_v25, %v1165_v9 }
 0x27a   : > { %v2806_v29 = vpop.permute.xlu1 %1281 }
 0x27b   : > { %2051 = vmatprep.mubr.bf16.mxu1 %v1369_v21 }
 0x27c   : > { %v2174_v38 = vpop.eup %2173  ;;  %v2812_v40 = vpop.permute.xlu0 %1296 }
 0x27d   : > { %1210 = vadd.xlane.f32.xlu1 %v2172_v46  ;;  %1208 = vadd.xlane.f32.xlu0 %v2174_v38  ;;  %v1370_v3 = vpack.c.bf16 %v2172_v46, %v2174_v38  ;;  %v2176_v2 = vpop.eup %2175  ;;  %v1161_v46 = vld [vmem:[#allocation3 + $0x28] sm:$0xff] }
 0x27e   : > { %v2810_v30 = vpop.permute.xlu1 %1291  ;;  %v1177_v20 = vmul.f32 %v2745_v62, %v1161_v46 }
 0x27f   : > { %2052 = vmatmul.mubr.bf16.gmra.mxu1 %v1370_v3 }
 0x280   : > { %v2178_v24 = vpop.eup %2177  ;;  %v2816_v1 = vpop.permute.xlu0 %1326 }
 0x281   : > { %1206 = vadd.xlane.f32.xlu1 %v2168_v26  ;;  %1204 = vadd.xlane.f32.xlu0 %v2170_v31  ;;  %v1371_v53 = vpack.c.bf16 %v2176_v2, %v2178_v24  ;;  %v2180_v59 = vpop.eup %2179  ;;  %v1179_v31 = vmul.f32 %v2737_v13, %v1163_v12  ;;  %v1164_v13 = vld [vmem:[#allocation3 + $0x40] sm:$0xff] }
 0x282   : > { %v2814_v45 = vpop.permute.xlu1 %1301  ;;  %v1180_v62 = vmul.f32 %v2766_v33, %v1164_v13  ;;  %v1169_v33 = vld [vmem:[#allocation3 + $0x68] sm:$0xff] }
 0x283   : > { %2055 = vmatprep.mubr.bf16.mxu1 %v1371_v53 }
 0x284   : > { %v2182_v61 = vpop.eup %2181  ;;  %v2820_v39 = vpop.permute.xlu0 %1316 }
 0x285   : > { %1218 = vadd.xlane.f32.xlu1 %v2180_v59  ;;  %1216 = vadd.xlane.f32.xlu0 %v2182_v61  ;;  %v1372_v8 = vpack.c.bf16 %v2180_v59, %v2182_v61  ;;  %v2794_v7 = vpop.eup %2183 }
 0x286   : > { %v2797_v14 = vpop.eup %2185  ;;  %v2818_v36 = vpop.permute.xlu1 %1321 }
 0x287   : > { %2056 = vmatmul.mubr.bf16.gmra.mxu1 %v1372_v8 }
 0x288   : > { %v2824_v18 = vpop.permute.xlu0 %1336 }
 0x289   : > { %1214 = vadd.xlane.f32.xlu1 %v2176_v2  ;;  %1212 = vadd.xlane.f32.xlu0 %v2178_v24  ;;  %v1166_v2 = vld [vmem:[#allocation3 + $0x50] sm:$0xff]  ;;  %v1167_v24 = vld [vmem:[#allocation3 + $0x58] sm:$0xff] }
 0x28a   : > { %v2822_v41 = vpop.permute.xlu1 %1311  ;;  %v1182_v19 = vmul.f32 %v2760_v28, %v1166_v2  ;;  %v1183_v59 = vmul.f32 %v2751_v22, %v1167_v24  ;;  %v1171_v28 = vld [vmem:[#allocation3 + $0x78] sm:$0xff] }
 0x28b   : > { %v1187_v34 = vmul.f32 %v2797_v14, %v1171_v28 }
 0x28e   : > { %v2826_v57 = vpop.permute.xlu1 %1331 }
 0x29a   : > { %1341 = vperm.xlu1 %2098, %v2794_v7  }
 0x29f   : > { %1346 = vperm.xlu0 %2097, %v2797_v14   ;;  %v1255_v14 = vld [vmem:[#allocation4 + $0x10] sm:$0xff] }
 0x2e4   : > { %v1193_v48 = vpop.xlane.xlu0 %1192 }
 0x2e5   : > { %v1222_v50 = vadd.f32 %v1193_v48, %v1174_v44 }
 0x2e6   : > { %v1189_v10 = vpop.xlane.xlu1 %1188 }
 0x2e7   : > { %1239 = vst.msk [vmem:[#allocation3 + $0x10] sm:$0xff] %vm445_vm0, %v1222_v50  ;;  %v1220_v5 = vadd.f32 %v1189_v10, %v1172_v52  ;;  %v1170_v50 = vld [vmem:[#allocation3 + $0x70] sm:$0xff] }
 0x2e8   : > { %v1186_v10 = vmul.f32 %v2794_v7, %v1170_v50  ;;  %v1262_v50 = vld [vmem:[#allocation4 + $0x48] sm:$0xff] }
 0x2e9   : > { %1237 = vst.msk [vmem:[#allocation3] sm:$0xff] %vm445_vm0, %v1220_v5 }
 0x2ea   : > { %v1195_v58 = vpop.xlane.xlu1 %1194 }
 0x2eb   : > { %v1223_v15 = vadd.f32 %v1195_v58, %v1175_v55  ;;  %v1168_v55 = vld [vmem:[#allocation3 + $0x60] sm:$0xff] }
 0x2ec   : > { %v1191_v27 = vpop.xlane.xlu0 %1190 }
 0x2ed   : > { %1240 = vst.msk [vmem:[#allocation3 + $0x18] sm:$0xff] %vm445_vm0, %v1223_v15  ;;  %v1221_v17 = vadd.f32 %v1191_v27, %v1173_v56  ;;  %v1184_v15 = vmul.f32 %v2769_v35, %v1168_v55  ;;  %v1185_v56 = vmul.f32 %v2763_v32, %v1169_v33  ;;  %v1254_v35 = vld [vmem:[#allocation4 + $0x8] sm:$0xff]  ;;  %v1352_v32 = vmul.f32 %v2804_v47, %v1256_v63  ;;  %v1260_v47 = vld [vmem:[#allocation4 + $0x38] sm:$0xff] }
 0x2ef   : > { %1238 = vst.msk [vmem:[#allocation3 + $0x8] sm:$0xff] %vm445_vm0, %v1221_v17 }
 0x2f2   : > { %v1201_v11 = vpop.xlane.xlu0 %1200 }
 0x2f3   : > { %v1226_v23 = vadd.f32 %v1201_v11, %v1178_v51  ;;  %v1253_v51 = vld [vmem:[#allocation4] sm:$0xff]  ;;  %v1351_v11 = vmul.f32 %v2806_v29, %v1255_v14 }
 0x2f5   : > { %1243 = vst.msk [vmem:[#allocation3 + $0x30] sm:$0xff] %vm445_vm0, %v1226_v23 }
 0x2f6   : > { %v1197_v0 = vpop.xlane.xlu0 %1196 }
 0x2f7   : > { %v1224_v26 = vadd.f32 %v1197_v0, %v1176_v6  ;;  %v1349_v6 = vmul.f32 %v2800_v16, %v1253_v51  ;;  %v1259_v16 = vld [vmem:[#allocation4 + $0x30] sm:$0xff] }
 0x2f9   : > { %1241 = vst.msk [vmem:[#allocation3 + $0x20] sm:$0xff] %vm445_vm0, %v1224_v26 }
 0x2fe   : > { %v1203_v21 = vpop.xlane.xlu1 %1202 }
 0x2ff   : > { %v1227_v38 = vadd.f32 %v1203_v21, %v1179_v31  ;;  %v1350_v21 = vmul.f32 %v2802_v37, %v1254_v35 }
 0x301   : > { %1244 = vst.msk [vmem:[#allocation3 + $0x38] sm:$0xff] %vm445_vm0, %v1227_v38 }
 0x302   : > { %v1199_v3 = vpop.xlane.xlu1 %1198 }
 0x303   : > { %v1225_v53 = vadd.f32 %v1199_v3, %v1177_v20  ;;  %v1257_v20 = vld [vmem:[#allocation4 + $0x20] sm:$0xff]  ;;  %v1355_v3 = vmul.f32 %v2814_v45, %v1259_v16 }
 0x304   : > { %v1353_v24 = vmul.f32 %v2810_v30, %v1257_v20  ;;  %v1261_v45 = vld [vmem:[#allocation4 + $0x40] sm:$0xff] }
 0x305   : > { %1242 = vst.msk [vmem:[#allocation3 + $0x28] sm:$0xff] %vm445_vm0, %v1225_v53 }
 0x306   : > { %v1209_v61 = vpop.xlane.xlu0 %1208  ;;  %v1211_v8 = vpop.xlane.xlu1 %1210 }
 0x307   : > { %v1230_v49 = vadd.f32 %v1209_v61, %v1182_v19  ;;  %v1231_v42 = vadd.f32 %v1211_v8, %v1183_v59  ;;  %v1258_v19 = vld [vmem:[#allocation4 + $0x28] sm:$0xff]  ;;  %v1356_v59 = vmul.f32 %v2808_v4, %v1260_v47  ;;  %v1263_v8 = vld [vmem:[#allocation4 + $0x50] sm:$0xff]  ;;  %v1357_v4 = vmul.f32 %v2822_v41, %v1261_v45 }
 0x308   : > { %v1354_v9 = vmul.f32 %v2812_v40, %v1258_v19 }
 0x309   : > { %1247 = vst.msk [vmem:[#allocation3 + $0x50] sm:$0xff] %vm445_vm0, %v1230_v49  ;;  %1248 = vst.msk [vmem:[#allocation3 + $0x58] sm:$0xff] %vm445_vm0, %v1231_v42 }
 0x30a   : > { %v1205_v44 = vpop.xlane.xlu0 %1204  ;;  %v1207_v48 = vpop.xlane.xlu1 %1206 }
 0x30b   : > { %v1228_v52 = vadd.f32 %v1205_v44, %v1180_v62  ;;  %v1229_v22 = vadd.f32 %v1207_v48, %v1181_v43  ;;  %v1359_v62 = vmul.f32 %v2818_v36, %v1263_v8  ;;  %v1264_v43 = vld [vmem:[#allocation4 + $0x58] sm:$0xff] }
 0x30c   : > { %v1360_v40 = vmul.f32 %v2816_v1, %v1264_v43 }
 0x30d   : > { %1245 = vst.msk [vmem:[#allocation3 + $0x40] sm:$0xff] %vm445_vm0, %v1228_v52  ;;  %1246 = vst.msk [vmem:[#allocation3 + $0x48] sm:$0xff] %vm445_vm0, %v1229_v22  ;;  %v1267_v22 = vld [vmem:[#allocation4 + $0x70] sm:$0xff] }
 0x30e   : > { %v1217_v5 = vpop.xlane.xlu0 %1216  ;;  %v1219_v54 = vpop.xlane.xlu1 %1218 }
 0x30f   : > { %v1234_v58 = vadd.f32 %v1217_v5, %v1186_v10  ;;  %v1235_v25 = vadd.f32 %v1219_v54, %v1187_v34  ;;  %v1358_v34 = vmul.f32 %v2820_v39, %v1262_v50  ;;  %v1265_v54 = vld [vmem:[#allocation4 + $0x60] sm:$0xff] }
 0x311   : > { %1251 = vst.msk [vmem:[#allocation3 + $0x70] sm:$0xff] %vm445_vm0, %v1234_v58  ;;  %1252 = vst.msk [vmem:[#allocation3 + $0x78] sm:$0xff] %vm445_vm0, %v1235_v25  ;;  %v1268_v58 = vld [vmem:[#allocation4 + $0x78] sm:$0xff] }
 0x312   : > { %v1213_v27 = vpop.xlane.xlu0 %1212  ;;  %v1215_v17 = vpop.xlane.xlu1 %1214 }
 0x313   : > { %v1232_v60 = vadd.f32 %v1213_v27, %v1184_v15  ;;  %v1233_v7 = vadd.f32 %v1215_v17, %v1185_v56  ;;  %v1361_v15 = vmul.f32 %v2826_v57, %v1265_v54  ;;  %v1266_v27 = vld [vmem:[#allocation4 + $0x68] sm:$0xff] }
 0x314   : > { %v1362_v14 = vmul.f32 %v2824_v18, %v1266_v27 }
 0x315   : > { %1249 = vst.msk [vmem:[#allocation3 + $0x60] sm:$0xff] %vm445_vm0, %v1232_v60  ;;  %1250 = vst.msk [vmem:[#allocation3 + $0x68] sm:$0xff] %vm445_vm0, %v1233_v7 }
 0x316   : > { %v1342_v10 = vpop.permute.xlu1 %1341 }
 0x317   : > { %v1363_v55 = vmul.f32 %v1342_v10, %v1267_v22 }
 0x31a   : > { %v1347_v25 = vpop.permute.xlu0 %1346 }
 0x31b   : > { %v1364_v39 = vmul.f32 %v1347_v25, %v1268_v58 }
 0x326   : > { %v2045_v23 = vpop.f32.mrf.mxu1 }
 0x327   : > { %v1520_v0 = vadd.f32 %v2045_v23, %v1351_v11 }
 0x328   : > { %v1455_v26 = vpop.f32.mrf.mxu1 }
 0x329   : > { %1536 = vst.msk [vmem:[#allocation4 + $0x10] sm:$0xff] %vm478_vm1, %v1520_v0  ;;  %v1518_v12 = vadd.f32 %v1455_v26, %v1349_v6 }
 0x32a   : > { %v2046_v31 = vpop.f32.mrf.mxu1 }
 0x32b   : > { %1534 = vst.msk [vmem:[#allocation4] sm:$0xff] %vm478_vm1, %v1518_v12  ;;  %v1521_v46 = vadd.f32 %v2046_v31, %v1352_v32 }
 0x32c   : > { %v1458_v38 = vpop.f32.mrf.mxu1 }
 0x32d   : > { %1537 = vst.msk [vmem:[#allocation4 + $0x18] sm:$0xff] %vm478_vm1, %v1521_v46  ;;  %v1519_v29 = vadd.f32 %v1458_v38, %v1350_v21 }
 0x32f   : > { %1535 = vst.msk [vmem:[#allocation4 + $0x8] sm:$0xff] %vm478_vm1, %v1519_v29 }
 0x337   : > { %v2049_v2 = vpop.f32.mrf.mxu1 }
 0x338   : > { %v1524_v53 = vadd.f32 %v2049_v2, %v1355_v3 }
 0x339   : > { %v1471_v37 = vpop.f32.mrf.mxu1 }
 0x33a   : > { %1540 = vst.msk [vmem:[#allocation4 + $0x30] sm:$0xff] %vm478_vm1, %v1524_v53  ;;  %v1522_v61 = vadd.f32 %v1471_v37, %v1353_v24 }
 0x33b   : > { %v2050_v13 = vpop.f32.mrf.mxu1 }
 0x33c   : > { %1538 = vst.msk [vmem:[#allocation4 + $0x20] sm:$0xff] %vm478_vm1, %v1522_v61  ;;  %v1525_v49 = vadd.f32 %v2050_v13, %v1356_v59 }
 0x33d   : > { %v1474_v42 = vpop.f32.mrf.mxu1 }
 0x33e   : > { %1541 = vst.msk [vmem:[#allocation4 + $0x38] sm:$0xff] %vm478_vm1, %v1525_v49  ;;  %v1523_v30 = vadd.f32 %v1474_v42, %v1354_v9 }
 0x33f   : > { %v2053_v44 = vpop.f32.mrf.mxu1 }
 0x340   : > { %1539 = vst.msk [vmem:[#allocation4 + $0x28] sm:$0xff] %vm478_vm1, %v1523_v30  ;;  %v1528_v48 = vadd.f32 %v2053_v44, %v1359_v62 }
 0x341   : > { %v1487_v28 = vpop.f32.mrf.mxu1 }
 0x342   : > { %1544 = vst.msk [vmem:[#allocation4 + $0x50] sm:$0xff] %vm478_vm1, %v1528_v48  ;;  %v1526_v52 = vadd.f32 %v1487_v28, %v1357_v4 }
 0x343   : > { %v2054_v36 = vpop.f32.mrf.mxu1 }
 0x344   : > { %1542 = vst.msk [vmem:[#allocation4 + $0x40] sm:$0xff] %vm478_vm1, %v1526_v52  ;;  %v1529_v5 = vadd.f32 %v2054_v36, %v1360_v40 }
 0x345   : > { %v1490_v41 = vpop.f32.mrf.mxu1 }
 0x346   : > { %1545 = vst.msk [vmem:[#allocation4 + $0x58] sm:$0xff] %vm478_vm1, %v1529_v5  ;;  %v1527_v33 = vadd.f32 %v1490_v41, %v1358_v34 }
 0x347   : > { %v2057_v1 = vpop.f32.mrf.mxu1 }
 0x348   : > { %1543 = vst.msk [vmem:[#allocation4 + $0x48] sm:$0xff] %vm478_vm1, %v1527_v33  ;;  %v1532_v56 = vadd.f32 %v2057_v1, %v1363_v55 }
 0x349   : > { %v1503_v17 = vpop.f32.mrf.mxu1 }
 0x34a   : > { %1548 = vst.msk [vmem:[#allocation4 + $0x70] sm:$0xff] %vm478_vm1, %v1532_v56  ;;  %v1530_v60 = vadd.f32 %v1503_v17, %v1361_v15 }
 0x34b   : > { %v2058_v7 = vpop.f32.mrf.mxu1 }
 0x34c   : > { %1546 = vst.msk [vmem:[#allocation4 + $0x60] sm:$0xff] %vm478_vm1, %v1530_v60  ;;  %v1533_v51 = vadd.f32 %v2058_v7, %v1364_v39 }
 0x34d   : > { %v1506_v11 = vpop.f32.mrf.mxu1 }
 0x34e   : > { %1549 = vst.msk [vmem:[#allocation4 + $0x78] sm:$0xff] %vm478_vm1, %v1533_v51  ;;  %v1531_v63 = vadd.f32 %v1506_v11, %v1362_v14 }
 0x350   : > { %1547 = vst.msk [vmem:[#allocation4 + $0x68] sm:$0xff] %vm478_vm1, %v1531_v63 }
 0x351 PF: > { %v1571_v57 = vld [vmem:[#allocation3 + $0x10] sm:$0xff]  ;;  %v1569_v23 = vld [vmem:[#allocation3] sm:$0xff]  ;;  %v1572_v6 = vld [vmem:[#allocation3 + $0x18] sm:$0xff]  ;;  %v2276_v0 = vmov 0  }
 0x352   : > { %2188 = vset.pattern.permute.xlu1 %v2276_v0  ;;  %2187 = vset.pattern.permute.xlu0 %v2276_v0  ;;  %vm1587_vm0 = vcmp.eq.f32.partialorder %v1571_v57, 0.0  ;;  %vm1585_vm10 = vcmp.eq.f32.partialorder %v1569_v23, 0.0  ;;  %vm1588_vm11 = vcmp.eq.f32.partialorder %v1572_v6, 0.0  ;;  %v1570_v18 = vld [vmem:[#allocation3 + $0x8] sm:$0xff]  ;;  %v1573_v26 = vld [vmem:[#allocation3 + $0x20] sm:$0xff]  ;;  %v1576_v46 = vld [vmem:[#allocation3 + $0x38] sm:$0xff] }
 0x353   : > { %v1574_v35 = vld [vmem:[#allocation3 + $0x28] sm:$0xff]  ;;  %v1603_v32 = vsel %vm1587_vm0, 1.0, %v1571_v57  ;;  %v1601_v12 = vsel %vm1585_vm10, 1.0, %v1569_v23  ;;  %v1604_v31 = vsel %vm1588_vm11, 1.0, %v1572_v6  ;;  %vm1586_vm12 = vcmp.eq.f32.partialorder %v1570_v18, 0.0  ;;  %v1575_v38 = vld [vmem:[#allocation3 + $0x30] sm:$0xff] }
 0x354   : > { %2189 = vrcp.f32 %v1603_v32  ;;  %v1602_v21 = vsel %vm1586_vm12, 1.0, %v1570_v18  ;;  %vm1590_vm13 = vcmp.eq.f32.partialorder %v1574_v35, 0.0  ;;  %vm1589_vm14 = vcmp.eq.f32.partialorder %v1573_v26, 0.0  ;;  %v1578_v20 = vld [vmem:[#allocation3 + $0x48] sm:$0xff]  ;;  %v1577_v3 = vld [vmem:[#allocation3 + $0x40] sm:$0xff]  ;;  %v1580_v24 = vld [vmem:[#allocation3 + $0x58] sm:$0xff] }
 0x355   : > { %2191 = vrcp.f32 %v1601_v12  ;;  %v1606_v29 = vsel %vm1590_vm13, 1.0, %v1574_v35  ;;  %v1605_v16 = vsel %vm1589_vm14, 1.0, %v1573_v26  ;;  %vm1592_vm15 = vcmp.eq.f32.partialorder %v1576_v46, 0.0  ;;  %v1579_v53 = vld [vmem:[#allocation3 + $0x50] sm:$0xff]  ;;  %v1582_v61 = vld [vmem:[#allocation3 + $0x68] sm:$0xff]  ;;  %v1581_v13 = vld [vmem:[#allocation3 + $0x60] sm:$0xff] }
 0x356   : > { %2193 = vrcp.f32 %v1604_v31  ;;  %vm1591_vm2 = vcmp.eq.f32.partialorder %v1575_v38, 0.0  ;;  %v1608_v47 = vsel %vm1592_vm15, 1.0, %v1576_v46  ;;  %vm1594_vm3 = vcmp.eq.f32.partialorder %v1578_v20, 0.0  ;;  %v1584_v62 = vld [vmem:[#allocation3 + $0x78] sm:$0xff]  ;;  %v1583_v30 = vld [vmem:[#allocation3 + $0x70] sm:$0xff]  ;;  %v1633_v58 = vld [vmem:[#allocation4] sm:$0xff] }
 0x357   : > { %2195 = vrcp.f32 %v1602_v21  ;;  %v1607_v2 = vsel %vm1591_vm2, 1.0, %v1575_v38  ;;  %vm1593_vm4 = vcmp.eq.f32.partialorder %v1577_v3, 0.0  ;;  %v1610_v19 = vsel %vm1594_vm3, 1.0, %v1578_v20  ;;  %v1635_v33 = vld [vmem:[#allocation4 + $0x10] sm:$0xff]  ;;  %v1636_v27 = vld [vmem:[#allocation4 + $0x18] sm:$0xff]  ;;  %v1634_v17 = vld [vmem:[#allocation4 + $0x8] sm:$0xff] }
 0x358   : > { %2197 = vrcp.f32 %v1606_v29  ;;  %v1609_v37 = vsel %vm1593_vm4, 1.0, %v1577_v3  ;;  %vm1596_vm5 = vcmp.eq.f32.partialorder %v1580_v24, 0.0  ;;  %vm1595_vm6 = vcmp.eq.f32.partialorder %v1579_v53, 0.0  ;;  %v1638_v51 = vld [vmem:[#allocation4 + $0x28] sm:$0xff]  ;;  %v1637_v11 = vld [vmem:[#allocation4 + $0x20] sm:$0xff]  ;;  %v1640_v0 = vld [vmem:[#allocation4 + $0x38] sm:$0xff] }
 0x359   : > { %2199 = vrcp.f32 %v1605_v16  ;;  %v1612_v49 = vsel %vm1596_vm5, 1.0, %v1580_v24  ;;  %v1611_v42 = vsel %vm1595_vm6, 1.0, %v1579_v53  ;;  %vm1598_vm7 = vcmp.eq.f32.partialorder %v1582_v61, 0.0  ;;  %v1639_v18 = vld [vmem:[#allocation4 + $0x30] sm:$0xff]  ;;  %v1642_v31 = vld [vmem:[#allocation4 + $0x48] sm:$0xff]  ;;  %v1641_v21 = vld [vmem:[#allocation4 + $0x40] sm:$0xff] }
 0x35a   : > { %2201 = vrcp.f32 %v1608_v47  ;;  %vm1597_vm8 = vcmp.eq.f32.partialorder %v1581_v13, 0.0  ;;  %v1614_v44 = vsel %vm1598_vm7, 1.0, %v1582_v61  ;;  %vm1600_vm9 = vcmp.eq.f32.partialorder %v1584_v62, 0.0  ;;  %v1644_v20 = vld [vmem:[#allocation4 + $0x58] sm:$0xff]  ;;  %v1643_v3 = vld [vmem:[#allocation4 + $0x50] sm:$0xff] }
 0x35b   : > { %2203 = vrcp.f32 %v1607_v2  ;;  %v1613_v48 = vsel %vm1597_vm8, 1.0, %v1581_v13  ;;  %vm1599_vm0 = vcmp.eq.f32.partialorder %v1583_v30, 0.0  ;;  %v1616_v28 = vsel %vm1600_vm9, 1.0, %v1584_v62 }
 0x35c   : > { %2205 = vrcp.f32 %v1610_v19  ;;  %v1615_v52 = vsel %vm1599_vm0, 1.0, %v1583_v30  ;;  %v1646_v19 = vld [vmem:[#allocation4 + $0x68] sm:$0xff] }
 0x35d   : > { %2207 = vrcp.f32 %v1609_v37  ;;  %v1645_v37 = vld [vmem:[#allocation4 + $0x60] sm:$0xff] }
 0x35e   : > { %2209 = vrcp.f32 %v1612_v49  ;;  %v1647_v49 = vld [vmem:[#allocation4 + $0x70] sm:$0xff] }
 0x35f   : > { %2211 = vrcp.f32 %v1611_v42 }
 0x360   : > { %2213 = vrcp.f32 %v1614_v44 }
 0x361   : > { %v2190_v59 = vpop.eup %2189  ;;  %2215 = vrcp.f32 %v1613_v48 }
 0x362   : > { %v2192_v8 = vpop.eup %2191  ;;  %1661 = vperm.xlu1 %2188, %v2190_v59   ;;  %2217 = vrcp.f32 %v1616_v28 }
 0x363   : > { %v2194_v9 = vpop.eup %2193  ;;  %1651 = vperm.xlu0 %2187, %v2192_v8   ;;  %2219 = vrcp.f32 %v1615_v52 }
 0x364   : > { %v2196_v45 = vpop.eup %2195 }
 0x365   : > { %v2198_v43 = vpop.eup %2197 }
 0x366   : > { %1666 = vperm.xlu1 %2188, %v2194_v9   ;;  %v2200_v4 = vpop.eup %2199  ;;  %v1648_v9 = vld [vmem:[#allocation4 + $0x78] sm:$0xff] }
 0x367   : > { %1656 = vperm.xlu0 %2187, %v2196_v45   ;;  %v2202_v50 = vpop.eup %2201 }
 0x368   : > { %v2204_v40 = vpop.eup %2203 }
 0x369   : > { %v2206_v22 = vpop.eup %2205 }
 0x36a   : > { %1676 = vperm.xlu1 %2188, %v2198_v43   ;;  %v2208_v10 = vpop.eup %2207 }
 0x36b   : > { %1671 = vperm.xlu0 %2187, %v2200_v4   ;;  %v2210_v36 = vpop.eup %2209 }
 0x36c   : > { %v2212_v34 = vpop.eup %2211 }
 0x36d   : > { %v2214_v5 = vpop.eup %2213 }
 0x36e   : > { %1686 = vperm.xlu1 %2188, %v2202_v50   ;;  %v2216_v54 = vpop.eup %2215 }
 0x36f   : > { %1681 = vperm.xlu0 %2187, %v2204_v40   ;;  %v2218_v41 = vpop.eup %2217 }
 0x370   : > { %v2220_v55 = vpop.eup %2219 }
 0x372   : > { %1696 = vperm.xlu1 %2188, %v2206_v22  }
 0x373   : > { %1691 = vperm.xlu0 %2187, %v2208_v10  }
 0x376   : > { %1706 = vperm.xlu1 %2188, %v2210_v36  }
 0x377   : > { %1701 = vperm.xlu0 %2187, %v2212_v34  }
 0x37a   : > { %1716 = vperm.xlu1 %2188, %v2214_v5  }
 0x37b   : > { %1711 = vperm.xlu0 %2187, %v2216_v54  }
 0x37e   : > { %1726 = vperm.xlu1 %2188, %v2218_v41  }
 0x37f   : > { %1721 = vperm.xlu0 %2187, %v2220_v55  }
 0x3dd   : > { %v1662_v25 = vpop.permute.xlu1 %1661 }
 0x3de   : > { %v1731_v1 = vmul.f32 %v1662_v25, %v1635_v33  ;;  %v1652_v15 = vpop.permute.xlu0 %1651 }
 0x3df   : > { %v1729_v56 = vmul.f32 %v1652_v15, %v1633_v58 }
 0x3e0   : > { %1748 = vst.msk [vmem:[%s2413_s24 + $0x10] sm:$0xff] %vm478_vm1, %v1731_v1 }
 0x3e1   : > { %1746 = vst.msk [vmem:[%s2413_s24] sm:$0xff] %vm478_vm1, %v1729_v56  ;;  %v1667_v39 = vpop.permute.xlu1 %1666 }
 0x3e2   : > { %v1732_v60 = vmul.f32 %v1667_v39, %v1636_v27  ;;  %v1657_v7 = vpop.permute.xlu0 %1656 }
 0x3e3   : > { %v1730_v14 = vmul.f32 %v1657_v7, %v1634_v17 }
 0x3e4   : > { %1749 = vst.msk [vmem:[%s2413_s24 + $0x18] sm:$0xff] %vm478_vm1, %v1732_v60 }
 0x3e5   : > { %1747 = vst.msk [vmem:[%s2413_s24 + $0x8] sm:$0xff] %vm478_vm1, %v1730_v14  ;;  %v1677_v63 = vpop.permute.xlu1 %1676 }
 0x3e6   : > { %v1734_v57 = vmul.f32 %v1677_v63, %v1638_v51  ;;  %v1672_v23 = vpop.permute.xlu0 %1671 }
 0x3e7   : > { %v1733_v6 = vmul.f32 %v1672_v23, %v1637_v11 }
 0x3e8   : > { %1751 = vst.msk [vmem:[%s2413_s24 + $0x28] sm:$0xff] %vm478_vm1, %v1734_v57 }
 0x3e9   : > { %1750 = vst.msk [vmem:[%s2413_s24 + $0x20] sm:$0xff] %vm478_vm1, %v1733_v6  ;;  %v1687_v35 = vpop.permute.xlu1 %1686 }
 0x3ea   : > { %v1736_v26 = vmul.f32 %v1687_v35, %v1640_v0  ;;  %v1682_v32 = vpop.permute.xlu0 %1681 }
 0x3eb   : > { %v1735_v12 = vmul.f32 %v1682_v32, %v1639_v18 }
 0x3ec   : > { %1753 = vst.msk [vmem:[%s2413_s24 + $0x38] sm:$0xff] %vm478_vm1, %v1736_v26 }
 0x3ed   : > { %1752 = vst.msk [vmem:[%s2413_s24 + $0x30] sm:$0xff] %vm478_vm1, %v1735_v12  ;;  %v1697_v46 = vpop.permute.xlu1 %1696 }
 0x3ee   : > { %v1738_v38 = vmul.f32 %v1697_v46, %v1642_v31  ;;  %v1692_v29 = vpop.permute.xlu0 %1691 }
 0x3ef   : > { %v1737_v16 = vmul.f32 %v1692_v29, %v1641_v21 }
 0x3f0   : > { %1755 = vst.msk [vmem:[%s2413_s24 + $0x48] sm:$0xff] %vm478_vm1, %v1738_v38 }
 0x3f1   : > { %1754 = vst.msk [vmem:[%s2413_s24 + $0x40] sm:$0xff] %vm478_vm1, %v1737_v16  ;;  %v1707_v47 = vpop.permute.xlu1 %1706 }
 0x3f2   : > { %v1740_v2 = vmul.f32 %v1707_v47, %v1644_v20  ;;  %v1702_v24 = vpop.permute.xlu0 %1701 }
 0x3f3   : > { %v1739_v53 = vmul.f32 %v1702_v24, %v1643_v3 }
 0x3f4   : > { %1757 = vst.msk [vmem:[%s2413_s24 + $0x58] sm:$0xff] %vm478_vm1, %v1740_v2 }
 0x3f5   : > { %1756 = vst.msk [vmem:[%s2413_s24 + $0x50] sm:$0xff] %vm478_vm1, %v1739_v53  ;;  %v1717_v59 = vpop.permute.xlu1 %1716 }
 0x3f6   : > { %v1742_v61 = vmul.f32 %v1717_v59, %v1646_v19  ;;  %v1712_v8 = vpop.permute.xlu0 %1711 }
 0x3f7   : > { %v1741_v13 = vmul.f32 %v1712_v8, %v1645_v37 }
 0x3f8   : > { %1759 = vst.msk [vmem:[%s2413_s24 + $0x68] sm:$0xff] %vm478_vm1, %v1742_v61 }
 0x3f9   : > { %1758 = vst.msk [vmem:[%s2413_s24 + $0x60] sm:$0xff] %vm478_vm1, %v1741_v13  ;;  %v1727_v45 = vpop.permute.xlu1 %1726 }
 0x3fa   : > { %v1744_v42 = vmul.f32 %v1727_v45, %v1648_v9  ;;  %v1722_v62 = vpop.permute.xlu0 %1721 }
 0x3fb   : > { %v1743_v30 = vmul.f32 %v1722_v62, %v1647_v49 }
 0x3fc   : > { %1761 = vst.msk [vmem:[%s2413_s24 + $0x78] sm:$0xff] %vm478_vm1, %v1744_v42 }
 0x3fd   : > { %1760 = vst.msk [vmem:[%s2413_s24 + $0x70] sm:$0xff] %vm478_vm1, %v1743_v30 }
 0x3fe PF: > { %s26_s7 = sadd.s32 1, %s2269_s7   ;;  %s2950_s1 = smov %s2265_s30 }
 0x3ff   : > { %p23_p5 = scmp.ge.s32.totalorder %s26_s7, 4   ;;  %s2951_s30 = smov %s2953_s8 }
 0x401   :  { %25 = sbr.rel (!%p23_p5) target bundleno = 27 (0x1b), region = 87 }

</bundles_post_ra>
